<compile_context>
chip_gen: v5e
topology: v5e:2x2
jax: 0.10.0
libtpu: 0.0.40
codegen_flags: <defaults>
</compile_context>

<pallas_src>
import functools
import math

import jax
import jax.numpy as jnp
from jax.experimental import pallas as pl
from jax.experimental.pallas import tpu as pltpu


def _round_up(x, m):
    return ((x + m - 1) // m) * m


# ----------------------------------------------------------------------------
# Fused GraphConvolution kernel
# ----------------------------------------------------------------------------
def _gcn_kernel(x_ref, w_ref, adj0_ref, adj1_ref, b_ref, o_ref, s_ref, *, fout_p):
    # Compute the support S = x @ [w1 | w2] once; it stays resident in VMEM
    # scratch across all row-tile grid steps.
    @pl.when(pl.program_id(0) == 0)
    def _():
        s = jnp.dot(x_ref[...], w_ref[...], preferred_element_type=jnp.float32)
        s_ref[...] = s.astype(jnp.bfloat16)

    s1 = s_ref[:, :fout_p]          # x @ w1   (bf16, padded)
    s2 = s_ref[:, fout_p:]          # x @ w2   (bf16, padded)
    o = jnp.dot(adj0_ref[...], s1, preferred_element_type=jnp.float32)
    o = o + jnp.dot(adj1_ref[...], s2, preferred_element_type=jnp.float32)
    o_ref[...] = o + b_ref[...]


@functools.lru_cache(maxsize=None)
def _build_gcn(vp, fin_p, fout_p, tm):
    kern = functools.partial(_gcn_kernel, fout_p=fout_p)
    fn = pl.pallas_call(
        kern,
        out_shape=jax.ShapeDtypeStruct((vp, fout_p), jnp.float32),
        grid_spec=pltpu.PrefetchScalarGridSpec(
            num_scalar_prefetch=0,
            grid=(vp // tm,),
            in_specs=[
                pl.BlockSpec((vp, fin_p), lambda i: (0, 0)),          # x (resident)
                pl.BlockSpec((fin_p, 2 * fout_p), lambda i: (0, 0)),  # [w1|w2] (resident)
                pl.BlockSpec((tm, vp), lambda i: (i, 0)),             # adj0 row tile
                pl.BlockSpec((tm, vp), lambda i: (i, 0)),             # adj1 row tile
                pl.BlockSpec((1, fout_p), lambda i: (0, 0)),          # bias (resident)
            ],
            out_specs=pl.BlockSpec((tm, fout_p), lambda i: (i, 0)),
            scratch_shapes=[pltpu.VMEM((vp, 2 * fout_p), jnp.bfloat16)],
        ),
        compiler_params=pltpu.CompilerParams(
            # scratch S is produced at grid step 0 and consumed by every later
            # step -> keep the row axis sequential (no megacore sharding).
            dimension_semantics=("arbitrary",),
        ),
    )
    return jax.jit(fn)


def graph_convolution(x, weight_1, weight_2, adj0, adj1, bias=None):
    """Pallas TPU forward of GraphConvolution.

    out = adj0 @ (x @ weight_1) + adj1 @ (x @ weight_2) [+ bias]
    Operands are fed to the MXU in bfloat16 with float32 accumulation.
    """
    x = jnp.asarray(x, jnp.float32)
    num_v, fin = x.shape
    fout = weight_1.shape[1]
    assert weight_1.shape == (fin, fout)
    assert weight_2.shape == (fin, fout)
    assert adj0.shape == (num_v, num_v) and adj1.shape == (num_v, num_v)
    if bias is None:
        bias = jnp.zeros((fout,), jnp.float32)

    # Padded / tiled geometry: rows padded to a multiple of the row tile,
    # feature dims padded to the 128-lane boundary (lane-dense stores).
    vp = _round_up(num_v, 256)
    tm = vp if vp <= 1024 else 256
    fin_p = _round_up(fin, 128)
    fout_p = _round_up(fout, 128)

    xb = jnp.zeros((vp, fin_p), jnp.bfloat16).at[:num_v, :fin].set(
        x.astype(jnp.bfloat16))
    wcat = jnp.zeros((fin_p, 2 * fout_p), jnp.bfloat16)
    wcat = wcat.at[:fin, :fout].set(jnp.asarray(weight_1, jnp.float32)
                                    .astype(jnp.bfloat16))
    wcat = wcat.at[:fin, fout_p:fout_p + fout].set(
        jnp.asarray(weight_2, jnp.float32).astype(jnp.bfloat16))
    a0 = jnp.zeros((vp, vp), jnp.bfloat16).at[:num_v, :num_v].set(
        jnp.asarray(adj0, jnp.float32).astype(jnp.bfloat16))
    a1 = jnp.zeros((vp, vp), jnp.bfloat16).at[:num_v, :num_v].set(
        jnp.asarray(adj1, jnp.float32).astype(jnp.bfloat16))
    bp = jnp.zeros((1, fout_p), jnp.float32).at[0, :fout].set(
        jnp.asarray(bias, jnp.float32))

    out = _build_gcn(vp, fin_p, fout_p, tm)(xb, wcat, a0, a1, bp)
    return out[:num_v, :fout]


# ----------------------------------------------------------------------------
# Reference + deterministic test harness
# ----------------------------------------------------------------------------
def gcn_reference(x, w1, w2, adj0, adj1, bias):
    out = adj0 @ (x @ w1) + adj1 @ (x @ w2)
    if bias is not None:
        out = out + bias
    return out


def make_case(key, num_v, fin, fout, avg_degree=6):
    ks = jax.random.split(key, 6)
    x = jax.random.normal(ks[0], (num_v, fin), jnp.float32)
    stdv = 1.0 / math.sqrt(fout)
    w1 = jax.random.uniform(ks[1], (fin, fout), jnp.float32, -stdv, stdv)
    w2 = jax.random.uniform(ks[2], (fin, fout), jnp.float32, -stdv, stdv)
    b = jax.random.uniform(ks[3], (fout,), jnp.float32, -stdv, stdv)
    # Chebyshev-style supports, densified:
    #   support 0 ~ identity, support 1 ~ sparse normalized adjacency.
    adj0 = jnp.eye(num_v, dtype=jnp.float32)
    mask = (jax.random.uniform(ks[4], (num_v, num_v)) < avg_degree / num_v)
    adj1 = mask.astype(jnp.float32) * jax.random.uniform(
        ks[5], (num_v, num_v), jnp.float32, 0.0, 0.5)
    return x, w1, w2, adj0, adj1, b


if __name__ == "__main__":
    key = jax.random.PRNGKey(0)
    k_small, k_big = jax.random.split(key)

    cases = [
        # (name, V, in_features, out_features)  — small Pixel2Mesh-like sizes
        ("single_tile", make_case(k_small, 156, 96, 32)),
        ("multi_tile", make_case(k_big, 1200, 192, 48)),
    ]

    for name, (x, w1, w2, adj0, adj1, b) in cases:
        out = graph_convolution(x, w1, w2, adj0, adj1, b)
        out = jax.block_until_ready(out)
        ref = gcn_reference(x, w1, w2, adj0, adj1, b)

        assert out.shape == ref.shape, (name, out.shape, ref.shape)
        assert bool(jnp.all(jnp.isfinite(out))), name
        err = float(jnp.max(jnp.abs(out - ref)) /
                    (jnp.max(jnp.abs(ref)) + 1e-6))
        # bf16 operands / fp32 accumulation: small rounding vs fp32 reference.
        assert err < 3e-2, (name, err)

    print("KERNEL_OK")
</pallas_src>

<mosaic_0001>
module attributes {stable_mosaic.version = 11 : i64} {
  func.func @_gcn_kernel(%arg0: i32, %arg1: memref<256x128xbf16, #tpu.memory_space<vmem>>, %arg2: memref<128x256xbf16, #tpu.memory_space<vmem>>, %arg3: memref<256x256xbf16, #tpu.memory_space<vmem>>, %arg4: memref<256x256xbf16, #tpu.memory_space<vmem>>, %arg5: memref<1x128xf32, #tpu.memory_space<vmem>>, %arg6: memref<256x128xf32, #tpu.memory_space<vmem>>, %arg7: memref<256x256xbf16, #tpu.memory_space<vmem>>) attributes {dimension_semantics = [#tpu.dimension_semantics<arbitrary>], iteration_bounds = array<i64: 1>, scalar_prefetch = 0 : i64, scratch_operands = 1 : i64, tpu.core_type = #tpu.core_type<tc>, window_params = [{pipeline_mode = #tpu.pipeline_mode<synchronous>, transform_indices = @transform_0, window_bounds = array<i64: 256, 128>}, {pipeline_mode = #tpu.pipeline_mode<synchronous>, transform_indices = @transform_1, window_bounds = array<i64: 128, 256>}, {transform_indices = @transform_2, window_bounds = array<i64: 256, 256>}, {transform_indices = @transform_3, window_bounds = array<i64: 256, 256>}, {pipeline_mode = #tpu.pipeline_mode<synchronous>, transform_indices = @transform_4, window_bounds = array<i64: 1, 128>}, {transform_indices = @transform_5, window_bounds = array<i64: 256, 128>}]} {
    %c0_i32 = arith.constant 0 : i32
    %0 = arith.cmpi eq, %arg0, %c0_i32 : i32
    %1 = arith.extui %0 : i1 to i32
    %c0_i32_0 = arith.constant 0 : i32
    %2 = arith.cmpi ne, %1, %c0_i32_0 : i32
    scf.if %2 {
      %c0_12 = arith.constant 0 : index
      %c0_13 = arith.constant 0 : index
      %14 = vector.load %arg1[%c0_12, %c0_13] : memref<256x128xbf16, #tpu.memory_space<vmem>>, vector<256x128xbf16>
      %c0_14 = arith.constant 0 : index
      %c0_15 = arith.constant 0 : index
      %15 = vector.load %arg2[%c0_14, %c0_15] : memref<128x256xbf16, #tpu.memory_space<vmem>>, vector<128x256xbf16>
      %cst_16 = arith.constant dense<0.000000e+00> : vector<256x256xf32>
      %16 = tpu.matmul %14, %15, %cst_16 {dimension_numbers = #tpu.dot_dimension_numbers<[1], [0], [0], [1], [0, 0, 1, 1], [], []>} : vector<256x128xbf16>, vector<128x256xbf16>, vector<256x256xf32> -> vector<256x256xf32>
      %17 = arith.truncf %16 : vector<256x256xf32> to vector<256x256xbf16>
      %c0_17 = arith.constant 0 : index
      %c0_18 = arith.constant 0 : index
      %18 = vector.load %arg7[%c0_17, %c0_18] : memref<256x256xbf16, #tpu.memory_space<vmem>>, vector<256x256xbf16>
      tpu.vector_store %arg7[%c0_17, %c0_18], %17 {strides = array<i32>} : memref<256x256xbf16, #tpu.memory_space<vmem>>, vector<256x256xbf16>,
    } else {
    }
    %c0 = arith.constant 0 : index
    %c0_1 = arith.constant 0 : index
    %3 = vector.load %arg7[%c0, %c0_1] : memref<256x256xbf16, #tpu.memory_space<vmem>>, vector<256x128xbf16>
    %c0_2 = arith.constant 0 : index
    %c128 = arith.constant 128 : index
    %4 = vector.load %arg7[%c0_2, %c128] : memref<256x256xbf16, #tpu.memory_space<vmem>>, vector<256x128xbf16>
    %c0_3 = arith.constant 0 : index
    %c0_4 = arith.constant 0 : index
    %5 = vector.load %arg3[%c0_3, %c0_4] : memref<256x256xbf16, #tpu.memory_space<vmem>>, vector<256x256xbf16>
    %cst = arith.constant dense<0.000000e+00> : vector<256x128xf32>
    %6 = tpu.matmul %5, %3, %cst {dimension_numbers = #tpu.dot_dimension_numbers<[1], [0], [0], [1], [0, 0, 1, 1], [], []>} : vector<256x256xbf16>, vector<256x128xbf16>, vector<256x128xf32> -> vector<256x128xf32>
    %c0_5 = arith.constant 0 : index
    %c0_6 = arith.constant 0 : index
    %7 = vector.load %arg4[%c0_5, %c0_6] : memref<256x256xbf16, #tpu.memory_space<vmem>>, vector<256x256xbf16>
    %cst_7 = arith.constant dense<0.000000e+00> : vector<256x128xf32>
    %8 = tpu.matmul %7, %4, %cst_7 {dimension_numbers = #tpu.dot_dimension_numbers<[1], [0], [0], [1], [0, 0, 1, 1], [], []>} : vector<256x256xbf16>, vector<256x128xbf16>, vector<256x128xf32> -> vector<256x128xf32>
    %9 = arith.addf %6, %8 : vector<256x128xf32>
    %c0_8 = arith.constant 0 : index
    %c0_9 = arith.constant 0 : index
    %10 = vector.load %arg5[%c0_8, %c0_9] : memref<1x128xf32, #tpu.memory_space<vmem>>, vector<1x128xf32>
    %11 = vector.broadcast %10 : vector<1x128xf32> to vector<256x128xf32>
    %12 = arith.addf %9, %11 : vector<256x128xf32>
    %c0_10 = arith.constant 0 : index
    %c0_11 = arith.constant 0 : index
    %13 = vector.load %arg6[%c0_10, %c0_11] : memref<256x128xf32, #tpu.memory_space<vmem>>, vector<256x128xf32>
    tpu.vector_store %arg6[%c0_10, %c0_11], %12 {strides = array<i32>} : memref<256x128xf32, #tpu.memory_space<vmem>>, vector<256x128xf32>,
    return
  }
  func.func @transform_0(%arg0: i32) -> (i32, i32) {
    %c0_i32 = arith.constant 0 : i32
    %c0_i32_0 = arith.constant 0 : i32
    %c0_i32_1 = arith.constant 0 : i32
    return %c0_i32, %c0_i32_0 : i32, i32
  }
  func.func @transform_1(%arg0: i32) -> (i32, i32) {
    %c0_i32 = arith.constant 0 : i32
    %c0_i32_0 = arith.constant 0 : i32
    %c0_i32_1 = arith.constant 0 : i32
    return %c0_i32, %c0_i32_0 : i32, i32
  }
  func.func @transform_2(%arg0: i32) -> (i32, i32) {
    %c0_i32 = arith.constant 0 : i32
    %c0_i32_0 = arith.constant 0 : i32
    return %arg0, %c0_i32 : i32, i32
  }
  func.func @transform_3(%arg0: i32) -> (i32, i32) {
    %c0_i32 = arith.constant 0 : i32
    %c0_i32_0 = arith.constant 0 : i32
    return %arg0, %c0_i32 : i32, i32
  }
  func.func @transform_4(%arg0: i32) -> (i32, i32) {
    %c0_i32 = arith.constant 0 : i32
    %c0_i32_0 = arith.constant 0 : i32
    %c0_i32_1 = arith.constant 0 : i32
    return %c0_i32, %c0_i32_0 : i32, i32
  }
  func.func @transform_5(%arg0: i32) -> (i32, i32) {
    %c0_i32 = arith.constant 0 : i32
    %c0_i32_0 = arith.constant 0 : i32
    return %arg0, %c0_i32 : i32, i32
  }
}

</mosaic_0001>

<bundles_post_ra>
// kernel: tpu_custom_call.1
= control target key start
LH: loop header
LB: loop body
LE: loop exit
PB: predicated region body
PF: predicated region fallthrough
CT: control target
= control target key end

     0   :  { %10 = vsyncpa [#allocation4], 0  ;;  %s2536_s0 = inlined_call_operand.hbm [shape: bf16[256,128], index: 0, kind: input, shape index: {}]   ;;  %s2537_s1 = inlined_call_operand.hbm [shape: bf16[128,256], index: 1, kind: input, shape index: {}]   ;;  %s2538_s2 = inlined_call_operand.hbm [shape: bf16[256,256], index: 2, kind: input, shape index: {}]   ;;  %s2539_s3 = inlined_call_operand.hbm [shape: bf16[256,256], index: 3, kind: input, shape index: {}]   ;;  %s2540_s4 = inlined_call_operand.vmem [shape: f32[1,128], index: 4, kind: input, shape index: {}]   ;;  %s2541_s5 = inlined_call_operand.hbm [shape: f32[256,128], index: 5, kind: output, shape index: {}]  }
   0x1   :  { %11 = vsyncpa [#allocation7], 0 }
   0x2   :  { %12 = vsyncpa [#allocation10], 0  ;;  %s31_s20 = sshll.u32 %s2537_s1, 4  ;;  %s32_s20 = int_to_ptr.hbm [resolvable:$true] %s31_s20 }
   0x3   :  { %13 = vsyncpa [#allocation5], 0  ;;  %s2433_s21 = smov [#allocation6]   ;;  %s18_s25 = sshll.u32 %s2536_s0, 4  ;;  %s19_s25 = int_to_ptr.hbm [resolvable:$true] %s18_s25 }
   0x4   :  { %s33_s22 = sshll.u32 %s2433_s21, 4  ;;  %s2434_s26 = smov 128   ;;  %s34_s22 = int_to_ptr.vmem [resolvable:$true] %s33_s22 }
   0x5   :  { %s2435_s27 = smov 8   ;;  %s2436_s28 = smov [#allocation3]  }
   0x6   :  { %39 = dma.hbm_to_vmem [thread:$0]  %s32_s20, 2048, %s34_s22, [#allocation7], %s2434_s26, %s2434_s26, %s2435_s27  }
   0x7   :  { %s20_s29 = sshll.u32 %s2436_s28, 4  ;;  %s2437_s1 = smov 64   ;;  %s21_s29 = int_to_ptr.vmem [resolvable:$true] %s20_s29 }
   0x8   :  { %s2438_s30 = smov 4   ;;  %s44_s8 = sshll.u32 %s2538_s2, 4  ;;  %s45_s8 = int_to_ptr.hbm [resolvable:$true] %s44_s8 }
   0x9   :  { %26 = dma.hbm_to_vmem [thread:$0]  %s19_s25, 2048, %s21_s29, [#allocation4], %s2437_s1, %s2437_s1, %s2438_s30  }
   0xa   :  { %s2439_s9 = smov [#allocation8]   ;;  %s57_s12 = sshll.u32 %s2539_s3, 4  ;;  %s58_s12 = int_to_ptr.hbm [resolvable:$true] %s57_s12 }
   0xb   :  { %s46_s0 = sshll.u32 %s2439_s9, 4  ;;  %s2440_s13 = smov [#allocation9]   ;;  %s47_s0 = int_to_ptr.vmem [resolvable:$true] %s46_s0 }
   0xc   :  { %52 = dma.hbm_to_vmem [thread:$0]  %s45_s8, 4096, %s47_s0, [#allocation7], %s2434_s26, %s2434_s26, %s2435_s27  }
   0xd   :  { %s59_s14 = sshll.u32 %s2440_s13, 4  ;;  %s60_s14 = int_to_ptr.vmem [resolvable:$true] %s59_s14 }
   0xe   :  { %65 = dma.hbm_to_vmem [thread:$0]  %s58_s12, 4096, %s60_s14, [#allocation10], %s2434_s26, %s2434_s26, %s2435_s27  }
   0xf   :  { %2425 = dma.done.wait [#allocation4], 2048  }
  0x10   :  { %2426 = vsyncadd [#allocation4], 4294965248 }
  0x11   :  { %2427 = dma.done.wait [#allocation7], 6144  }
  0x12   :  { %2428 = vsyncadd [#allocation7], 4294961152 }
  0x13   :  { %2429 = dma.done.wait [#allocation10], 4096  }
  0x14   :  { %2430 = vsyncadd [#allocation10], 4294963200  ;;  %v1761_v0 = vld [vmem:[#allocation6 + $0x70] sm:$0xf]  ;;  %v2182_v1 = vld [vmem:[#allocation6 + $0x74] sm:$0xf0] }
  0x15   :  { %v2181_v2 = vld [vmem:[#allocation6 + $0x74] sm:$0xf]  ;;  %v1762_v3 = vor.u32 %v2182_v1, %v1761_v0  ;;  %v1763_v4 = vld [vmem:[#allocation6 + $0x78] sm:$0xf0]  ;;  %v1753_v5 = vld [vmem:[#allocation6 + $0x60] sm:$0xf] }
  0x16   :  { %v2180_v6 = vld [vmem:[#allocation6 + $0x64] sm:$0xf0]  ;;  %v1766_v7 = vor.u32 %v2181_v2, %v1763_v4  ;;  %v2179_v8 = vld [vmem:[#allocation6 + $0x64] sm:$0xf]  ;;  %v1755_v9 = vld [vmem:[#allocation6 + $0x68] sm:$0xf0] }
  0x17   :  { %312 = vmatpush.bf16.msra.mxu0 %v1762_v3  ;;  %2279 = vmatpush.bf16.msra.mxu2 %v1762_v3  ;;  %v1754_v10 = vor.u32 %v2180_v6, %v1753_v5  ;;  %v1758_v11 = vor.u32 %v2179_v8, %v1755_v9  ;;  %v1745_v12 = vld [vmem:[#allocation6 + $0x50] sm:$0xf]  ;;  %v2178_v13 = vld [vmem:[#allocation6 + $0x54] sm:$0xf0]  ;;  %v2177_v14 = vld [vmem:[#allocation6 + $0x54] sm:$0xf] }
  0x18   :  { %401 = vmatpush.bf16.msra.mxu1 %v1766_v7  ;;  %2287 = vmatpush.bf16.msra.mxu3 %v1766_v7  ;;  %v1747_v15 = vld [vmem:[#allocation6 + $0x58] sm:$0xf0]  ;;  %v1746_v16 = vor.u32 %v2178_v13, %v1745_v12  ;;  %v1737_v18 = vld [vmem:[#allocation6 + $0x40] sm:$0xf]  ;;  %v2176_v19 = vld [vmem:[#allocation6 + $0x44] sm:$0xf0] }
  0x19   :  { %v1750_v17 = vor.u32 %v2177_v14, %v1747_v15  ;;  %v2175_v20 = vld [vmem:[#allocation6 + $0x44] sm:$0xf]  ;;  %v1739_v21 = vld [vmem:[#allocation6 + $0x48] sm:$0xf0]  ;;  %v1738_v22 = vor.u32 %v2176_v19, %v1737_v18  ;;  %v1729_v24 = vld [vmem:[#allocation6 + $0x30] sm:$0xf] }
  0x1a   :  { %v1742_v23 = vor.u32 %v2175_v20, %v1739_v21  ;;  %v2174_v25 = vld [vmem:[#allocation6 + $0x34] sm:$0xf0]  ;;  %v2173_v26 = vld [vmem:[#allocation6 + $0x34] sm:$0xf]  ;;  %v1731_v27 = vld [vmem:[#allocation6 + $0x38] sm:$0xf0] }
  0x1b   :  { %313 = vmatpush.bf16.msra.mxu0 %v1754_v10  ;;  %2280 = vmatpush.bf16.msra.mxu2 %v1754_v10  ;;  %v1730_v28 = vor.u32 %v2174_v25, %v1729_v24  ;;  %v1734_v29 = vor.u32 %v2173_v26, %v1731_v27  ;;  %v1721_v30 = vld [vmem:[#allocation6 + $0x20] sm:$0xf]  ;;  %v2172_v31 = vld [vmem:[#allocation6 + $0x24] sm:$0xf0]  ;;  %v2171_v32 = vld [vmem:[#allocation6 + $0x24] sm:$0xf] }
  0x1c   :  { %402 = vmatpush.bf16.msra.mxu1 %v1758_v11  ;;  %2288 = vmatpush.bf16.msra.mxu3 %v1758_v11  ;;  %v1723_v33 = vld [vmem:[#allocation6 + $0x28] sm:$0xf0]  ;;  %v1722_v34 = vor.u32 %v2172_v31, %v1721_v30  ;;  %v1713_v36 = vld [vmem:[#allocation6 + $0x10] sm:$0xf]  ;;  %v2170_v37 = vld [vmem:[#allocation6 + $0x14] sm:$0xf0] }
  0x1d   :  { %v1726_v35 = vor.u32 %v2171_v32, %v1723_v33  ;;  %v2169_v38 = vld [vmem:[#allocation6 + $0x14] sm:$0xf]  ;;  %v1715_v39 = vld [vmem:[#allocation6 + $0x18] sm:$0xf0]  ;;  %v1714_v40 = vor.u32 %v2170_v37, %v1713_v36  ;;  %v1705_v42 = vld [vmem:[#allocation6] sm:$0xf] }
  0x1e   :  { %v1718_v41 = vor.u32 %v2169_v38, %v1715_v39  ;;  %v2168_v43 = vld [vmem:[#allocation6 + $0x4] sm:$0xf0]  ;;  %v2167_v44 = vld [vmem:[#allocation6 + $0x4] sm:$0xf]  ;;  %v1707_v45 = vld [vmem:[#allocation6 + $0x8] sm:$0xf0] }
  0x1f   :  { %314 = vmatpush.bf16.msra.mxu0 %v1746_v16  ;;  %2281 = vmatpush.bf16.msra.mxu2 %v1746_v16  ;;  %v1706_v46 = vor.u32 %v2168_v43, %v1705_v42  ;;  %v1710_v47 = vor.u32 %v2167_v44, %v1707_v45  ;;  %v2151_v48 = vld [vmem:[#allocation3] sm:$0xff]  ;;  %v2152_v50 = vld [vmem:[#allocation3 + $0x8] sm:$0xff]  ;;  %v2153_v52 = vld [vmem:[#allocation3 + $0x10] sm:$0xff]  ;;  %s1624_s18 = sshll.u32 %s2541_s5, 4  ;;  %s1625_s18 = int_to_ptr.hbm [resolvable:$true] %s1624_s18 }
  0x20   :  { %403 = vmatpush.bf16.msra.mxu1 %v1750_v17  ;;  %2289 = vmatpush.bf16.msra.mxu3 %v1750_v17  ;;  %v2159_v49 = vld [vmem:[#allocation3 + $0x40] sm:$0xff]  ;;  %v2160_v51 = vld [vmem:[#allocation3 + $0x48] sm:$0xff]  ;;  %v2161_v53 = vld [vmem:[#allocation3 + $0x50] sm:$0xff] }
  0x21   :  { %v2154_v54 = vld [vmem:[#allocation3 + $0x18] sm:$0xff]  ;;  %v2155_v56 = vld [vmem:[#allocation3 + $0x20] sm:$0xff]  ;;  %v2156_v58 = vld [vmem:[#allocation3 + $0x28] sm:$0xff] }
  0x22   :  { %v2162_v55 = vld [vmem:[#allocation3 + $0x58] sm:$0xff]  ;;  %v2163_v57 = vld [vmem:[#allocation3 + $0x60] sm:$0xff]  ;;  %v2164_v59 = vld [vmem:[#allocation3 + $0x68] sm:$0xff] }
  0x23   :  { %315 = vmatpush.bf16.msra.mxu0 %v1738_v22  ;;  %2282 = vmatpush.bf16.msra.mxu2 %v1738_v22  ;;  %v2157_v60 = vld [vmem:[#allocation3 + $0x30] sm:$0xff]  ;;  %v2158_v62 = vld [vmem:[#allocation3 + $0x38] sm:$0xff] }
  0x24   :  { %404 = vmatpush.bf16.msra.mxu1 %v1742_v23  ;;  %2290 = vmatpush.bf16.msra.mxu3 %v1742_v23  ;;  %v2165_v61 = vld [vmem:[#allocation3 + $0x70] sm:$0xff]  ;;  %v2166_v63 = vld [vmem:[#allocation3 + $0x78] sm:$0xff] }
  0x27   :  { %316 = vmatpush.bf16.msra.mxu0 %v1730_v28  ;;  %2283 = vmatpush.bf16.msra.mxu2 %v1730_v28 }
  0x28   :  { %405 = vmatpush.bf16.msra.mxu1 %v1734_v29  ;;  %2291 = vmatpush.bf16.msra.mxu3 %v1734_v29 }
  0x2b   :  { %317 = vmatpush.bf16.msra.mxu0 %v1722_v34  ;;  %2284 = vmatpush.bf16.msra.mxu2 %v1722_v34 }
  0x2c   :  { %406 = vmatpush.bf16.msra.mxu1 %v1726_v35  ;;  %2292 = vmatpush.bf16.msra.mxu3 %v1726_v35 }
  0x2f   :  { %318 = vmatpush.bf16.msra.mxu0 %v1714_v40  ;;  %2285 = vmatpush.bf16.msra.mxu2 %v1714_v40 }
  0x30   :  { %407 = vmatpush.bf16.msra.mxu1 %v1718_v41  ;;  %2293 = vmatpush.bf16.msra.mxu3 %v1718_v41 }
  0x33   :  { %319 = vmatpush.bf16.msra.mxu0 %v1706_v46  ;;  %2286 = vmatpush.bf16.msra.mxu2 %v1706_v46 }
  0x34   :  { %408 = vmatpush.bf16.msra.mxu1 %v1710_v47  ;;  %2294 = vmatpush.bf16.msra.mxu3 %v1710_v47 }
  0x36   :  { %320 = vmatmul.bf16.vlgmr.msra.gmra.mxu0 %v2151_v48  ;;  %360 = vmatmul.bf16.vlgmr.msra.gmra.mxu2 %v2159_v49 }
  0x37   :  { %409 = vmatmul.bf16.vlgmr.msra.gmra.mxu1 %v2151_v48  ;;  %449 = vmatmul.bf16.vlgmr.msra.gmra.mxu3 %v2159_v49 }
  0x46   :  { %325 = vmatmul.bf16.gmra.mxu0 %v2152_v50  ;;  %365 = vmatmul.bf16.gmra.mxu2 %v2160_v51 }
  0x47   :  { %414 = vmatmul.bf16.gmra.mxu1 %v2152_v50  ;;  %454 = vmatmul.bf16.gmra.mxu3 %v2160_v51 }
  0x56   :  { %330 = vmatmul.bf16.gmra.mxu0 %v2153_v52  ;;  %370 = vmatmul.bf16.gmra.mxu2 %v2161_v53 }
  0x57   :  { %419 = vmatmul.bf16.gmra.mxu1 %v2153_v52  ;;  %459 = vmatmul.bf16.gmra.mxu3 %v2161_v53 }
  0x66   :  { %335 = vmatmul.bf16.gmra.mxu0 %v2154_v54  ;;  %375 = vmatmul.bf16.gmra.mxu2 %v2162_v55 }
  0x67   :  { %424 = vmatmul.bf16.gmra.mxu1 %v2154_v54  ;;  %464 = vmatmul.bf16.gmra.mxu3 %v2162_v55 }
  0x76   :  { %340 = vmatmul.bf16.gmra.mxu0 %v2155_v56  ;;  %380 = vmatmul.bf16.gmra.mxu2 %v2163_v57 }
  0x77   :  { %429 = vmatmul.bf16.gmra.mxu1 %v2155_v56  ;;  %469 = vmatmul.bf16.gmra.mxu3 %v2163_v57 }
  0x86   :  { %345 = vmatmul.bf16.gmra.mxu0 %v2156_v58  ;;  %385 = vmatmul.bf16.gmra.mxu2 %v2164_v59 }
  0x87   :  { %434 = vmatmul.bf16.gmra.mxu1 %v2156_v58  ;;  %474 = vmatmul.bf16.gmra.mxu3 %v2164_v59 }
  0x96   :  { %350 = vmatmul.bf16.gmra.mxu0 %v2157_v60  ;;  %390 = vmatmul.bf16.gmra.mxu2 %v2165_v61 }
  0x97   :  { %439 = vmatmul.bf16.gmra.mxu1 %v2157_v60  ;;  %479 = vmatmul.bf16.gmra.mxu3 %v2165_v61 }
  0xa6   :  { %355 = vmatmul.bf16.gmra.mxu0 %v2158_v62  ;;  %395 = vmatmul.bf16.gmra.mxu2 %v2166_v63 }
  0xa7   :  { %444 = vmatmul.bf16.gmra.mxu1 %v2158_v62  ;;  %484 = vmatmul.bf16.gmra.mxu3 %v2166_v63 }
  0xb3   :  { %v321_v0 = vpop.f32.mrf.mxu0 }
  0xb4   :  { %v410_v1 = vpop.f32.mrf.mxu1 }
  0xb5   :  { %v490_v2 = vpack.c.bf16 %v410_v1, %v321_v0 }
  0xb7   :  { %522 = vst [vmem:[#allocation2] sm:$0xff] %v490_v2 }
  0xb9   :  { %v361_v3 = vpop.f32.mrf.mxu2 }
  0xba   :  { %v450_v4 = vpop.f32.mrf.mxu3 }
  0xbb   :  { %v506_v5 = vpack.c.bf16 %v450_v4, %v361_v3  ;;  %v323_v6 = vpop.f32.mrf.mxu0 }
  0xbc   :  { %v412_v7 = vpop.f32.mrf.mxu1 }
  0xbd   :  { %538 = vst [vmem:[#allocation2 + $0x80] sm:$0xff] %v506_v5  ;;  %v491_v8 = vpack.c.bf16 %v412_v7, %v323_v6 }
  0xbf   :  { %523 = vst [vmem:[#allocation2 + $0x8] sm:$0xff] %v491_v8 }
  0xc1   :  { %v363_v9 = vpop.f32.mrf.mxu2 }
  0xc2   :  { %v452_v10 = vpop.f32.mrf.mxu3 }
  0xc3   :  { %v507_v11 = vpack.c.bf16 %v452_v10, %v363_v9  ;;  %v326_v12 = vpop.f32.mrf.mxu0 }
  0xc4   :  { %v415_v13 = vpop.f32.mrf.mxu1 }
  0xc5   :  { %539 = vst [vmem:[#allocation2 + $0x88] sm:$0xff] %v507_v11  ;;  %v492_v14 = vpack.c.bf16 %v415_v13, %v326_v12 }
  0xc7   :  { %524 = vst [vmem:[#allocation2 + $0x10] sm:$0xff] %v492_v14 }
  0xc9   :  { %v366_v15 = vpop.f32.mrf.mxu2 }
  0xca   :  { %v455_v16 = vpop.f32.mrf.mxu3 }
  0xcb   :  { %v508_v17 = vpack.c.bf16 %v455_v16, %v366_v15  ;;  %v328_v18 = vpop.f32.mrf.mxu0 }
  0xcc   :  { %v417_v19 = vpop.f32.mrf.mxu1 }
  0xcd   :  { %540 = vst [vmem:[#allocation2 + $0x90] sm:$0xff] %v508_v17  ;;  %v493_v20 = vpack.c.bf16 %v417_v19, %v328_v18 }
  0xcf   :  { %525 = vst [vmem:[#allocation2 + $0x18] sm:$0xff] %v493_v20 }
  0xd1   :  { %v368_v21 = vpop.f32.mrf.mxu2 }
  0xd2   :  { %v457_v22 = vpop.f32.mrf.mxu3 }
  0xd3   :  { %v509_v23 = vpack.c.bf16 %v457_v22, %v368_v21  ;;  %v331_v24 = vpop.f32.mrf.mxu0 }
  0xd4   :  { %v420_v25 = vpop.f32.mrf.mxu1 }
  0xd5   :  { %541 = vst [vmem:[#allocation2 + $0x98] sm:$0xff] %v509_v23  ;;  %v494_v26 = vpack.c.bf16 %v420_v25, %v331_v24 }
  0xd7   :  { %526 = vst [vmem:[#allocation2 + $0x20] sm:$0xff] %v494_v26 }
  0xd9   :  { %v371_v27 = vpop.f32.mrf.mxu2 }
  0xda   :  { %v460_v28 = vpop.f32.mrf.mxu3 }
  0xdb   :  { %v510_v29 = vpack.c.bf16 %v460_v28, %v371_v27  ;;  %v333_v30 = vpop.f32.mrf.mxu0 }
  0xdc   :  { %v422_v31 = vpop.f32.mrf.mxu1 }
  0xdd   :  { %542 = vst [vmem:[#allocation2 + $0xa0] sm:$0xff] %v510_v29  ;;  %v495_v32 = vpack.c.bf16 %v422_v31, %v333_v30 }
  0xdf   :  { %527 = vst [vmem:[#allocation2 + $0x28] sm:$0xff] %v495_v32 }
  0xe1   :  { %v373_v33 = vpop.f32.mrf.mxu2 }
  0xe2   :  { %v462_v34 = vpop.f32.mrf.mxu3 }
  0xe3   :  { %v511_v35 = vpack.c.bf16 %v462_v34, %v373_v33  ;;  %v336_v36 = vpop.f32.mrf.mxu0 }
  0xe4   :  { %v425_v37 = vpop.f32.mrf.mxu1 }
  0xe5   :  { %543 = vst [vmem:[#allocation2 + $0xa8] sm:$0xff] %v511_v35  ;;  %v496_v38 = vpack.c.bf16 %v425_v37, %v336_v36 }
  0xe7   :  { %528 = vst [vmem:[#allocation2 + $0x30] sm:$0xff] %v496_v38 }
  0xe9   :  { %v376_v39 = vpop.f32.mrf.mxu2 }
  0xea   :  { %v465_v40 = vpop.f32.mrf.mxu3 }
  0xeb   :  { %v512_v41 = vpack.c.bf16 %v465_v40, %v376_v39  ;;  %v338_v42 = vpop.f32.mrf.mxu0 }
  0xec   :  { %v427_v43 = vpop.f32.mrf.mxu1 }
  0xed   :  { %544 = vst [vmem:[#allocation2 + $0xb0] sm:$0xff] %v512_v41  ;;  %v497_v44 = vpack.c.bf16 %v427_v43, %v338_v42 }
  0xef   :  { %529 = vst [vmem:[#allocation2 + $0x38] sm:$0xff] %v497_v44 }
  0xf1   :  { %v378_v45 = vpop.f32.mrf.mxu2 }
  0xf2   :  { %v467_v46 = vpop.f32.mrf.mxu3 }
  0xf3   :  { %v513_v47 = vpack.c.bf16 %v467_v46, %v378_v45  ;;  %v341_v48 = vpop.f32.mrf.mxu0 }
  0xf4   :  { %v430_v49 = vpop.f32.mrf.mxu1 }
  0xf5   :  { %545 = vst [vmem:[#allocation2 + $0xb8] sm:$0xff] %v513_v47  ;;  %v498_v50 = vpack.c.bf16 %v430_v49, %v341_v48 }
  0xf7   :  { %530 = vst [vmem:[#allocation2 + $0x40] sm:$0xff] %v498_v50 }
  0xf9   :  { %v381_v51 = vpop.f32.mrf.mxu2 }
  0xfa   :  { %v470_v52 = vpop.f32.mrf.mxu3 }
  0xfb   :  { %v514_v53 = vpack.c.bf16 %v470_v52, %v381_v51  ;;  %v343_v54 = vpop.f32.mrf.mxu0 }
  0xfc   :  { %v432_v55 = vpop.f32.mrf.mxu1 }
  0xfd   :  { %546 = vst [vmem:[#allocation2 + $0xc0] sm:$0xff] %v514_v53  ;;  %v499_v56 = vpack.c.bf16 %v432_v55, %v343_v54 }
  0xff   :  { %531 = vst [vmem:[#allocation2 + $0x48] sm:$0xff] %v499_v56 }
 0x101   :  { %v383_v57 = vpop.f32.mrf.mxu2 }
 0x102   :  { %v472_v58 = vpop.f32.mrf.mxu3 }
 0x103   :  { %v515_v59 = vpack.c.bf16 %v472_v58, %v383_v57  ;;  %v346_v60 = vpop.f32.mrf.mxu0 }
 0x104   :  { %v435_v61 = vpop.f32.mrf.mxu1 }
 0x105   :  { %547 = vst [vmem:[#allocation2 + $0xc8] sm:$0xff] %v515_v59  ;;  %v500_v62 = vpack.c.bf16 %v435_v61, %v346_v60 }
 0x106   :  { %v2203_v58 = vld [vmem:[#allocation2 + $0x48] sm:$0xf0]  ;;  %v2187_v61 = vld [vmem:[#allocation2 + $0x44] sm:$0xf0] }
 0x107   :  { %532 = vst [vmem:[#allocation2 + $0x50] sm:$0xff] %v500_v62 }
 0x109   :  { %v386_v63 = vpop.f32.mrf.mxu2 }
 0x10a   :  { %v475_v0 = vpop.f32.mrf.mxu3 }
 0x10b   :  { %v516_v1 = vpack.c.bf16 %v475_v0, %v386_v63  ;;  %v348_v2 = vpop.f32.mrf.mxu0  ;;  %v1913_v0 = vld [vmem:[#allocation2 + $0x44] sm:$0xf] }
 0x10c   :  { %v437_v3 = vpop.f32.mrf.mxu1 }
 0x10d   :  { %548 = vst [vmem:[#allocation2 + $0xd0] sm:$0xff] %v516_v1  ;;  %v501_v4 = vpack.c.bf16 %v437_v3, %v348_v2  ;;  %v2105_v1 = vld [vmem:[#allocation2 + $0x40] sm:$0xf] }
 0x10e   :  { %v1917_v52 = vld [vmem:[#allocation2 + $0x54] sm:$0xf]  ;;  %v2109_v53 = vld [vmem:[#allocation2 + $0x50] sm:$0xf] }
 0x10f   :  { %533 = vst [vmem:[#allocation2 + $0x58] sm:$0xff] %v501_v4  ;;  %v1914_v4 = vor.u32 %v2203_v58, %v1913_v0  ;;  %v1933_v58 = vld [vmem:[#allocation2 + $0x94] sm:$0xf]  ;;  %v2207_v0 = vld [vmem:[#allocation2 + $0x88] sm:$0xf0] }
 0x111   :  { %v388_v5 = vpop.f32.mrf.mxu2 }
 0x112   :  { %v477_v6 = vpop.f32.mrf.mxu3 }
 0x113   :  { %v517_v7 = vpack.c.bf16 %v477_v6, %v388_v5  ;;  %v351_v8 = vpop.f32.mrf.mxu0  ;;  %v2106_v5 = vor.u32 %v2187_v61, %v2105_v1  ;;  %v2202_v6 = vld [vmem:[#allocation2 + $0x38] sm:$0xf0]  ;;  %v2191_v1 = vld [vmem:[#allocation2 + $0x84] sm:$0xf0] }
 0x114   :  { %v440_v9 = vpop.f32.mrf.mxu1 }
 0x115   :  { %549 = vst [vmem:[#allocation2 + $0xd8] sm:$0xff] %v517_v7  ;;  %v502_v10 = vpack.c.bf16 %v440_v9, %v351_v8  ;;  %v1949_v7 = vld [vmem:[#allocation2 + $0xd4] sm:$0xf]  ;;  %v2141_v8 = vld [vmem:[#allocation2 + $0xd0] sm:$0xf] }
 0x116   :  { %v2204_v45 = vld [vmem:[#allocation2 + $0x58] sm:$0xf0]  ;;  %v2188_v46 = vld [vmem:[#allocation2 + $0x54] sm:$0xf0] }
 0x117   :  { %534 = vst [vmem:[#allocation2 + $0x60] sm:$0xff] %v502_v10  ;;  %v1918_v56 = vor.u32 %v2204_v45, %v1917_v52  ;;  %v2110_v57 = vor.u32 %v2188_v46, %v2109_v53  ;;  %v2186_v9 = vld [vmem:[#allocation2 + $0x34] sm:$0xf0]  ;;  %v2129_v45 = vld [vmem:[#allocation2 + $0xa0] sm:$0xf] }
 0x118   :  { %v1897_v46 = vld [vmem:[#allocation2 + $0x4] sm:$0xf]  ;;  %v2216_v52 = vld [vmem:[#allocation8 + $0x4] sm:$0xf0]  ;;  %v2089_v53 = vld [vmem:[#allocation2] sm:$0xf] }
 0x119   :  { %v391_v11 = vpop.f32.mrf.mxu2 }
 0x11a   :  { %v480_v12 = vpop.f32.mrf.mxu3 }
 0x11b   :  { %v518_v13 = vpack.c.bf16 %v480_v12, %v391_v11  ;;  %v353_v14 = vpop.f32.mrf.mxu0  ;;  %v1909_v12 = vld [vmem:[#allocation2 + $0x34] sm:$0xf] }
 0x11c   :  { %v442_v15 = vpop.f32.mrf.mxu1  ;;  %v2212_v2 = vld [vmem:[#allocation2 + $0xd8] sm:$0xf0]  ;;  %v2196_v3 = vld [vmem:[#allocation2 + $0xd4] sm:$0xf0] }
 0x11d   :  { %550 = vst [vmem:[#allocation2 + $0xe0] sm:$0xff] %v518_v13  ;;  %v503_v16 = vpack.c.bf16 %v442_v15, %v353_v14  ;;  %v1950_v10 = vor.u32 %v2212_v2, %v1949_v7  ;;  %v2142_v11 = vor.u32 %v2196_v3, %v2141_v8  ;;  %v2101_v13 = vld [vmem:[#allocation2 + $0x30] sm:$0xf]  ;;  %v2211_v14 = vld [vmem:[#allocation2 + $0xc8] sm:$0xf0] }
 0x11e   :  { %v1921_v40 = vld [vmem:[#allocation2 + $0x64] sm:$0xf]  ;;  %v2113_v41 = vld [vmem:[#allocation2 + $0x60] sm:$0xf]  ;;  %v2195_v15 = vld [vmem:[#allocation2 + $0xc4] sm:$0xf0] }
 0x11f   :  { %535 = vst [vmem:[#allocation2 + $0x68] sm:$0xff] %v503_v16  ;;  %v1910_v16 = vor.u32 %v2202_v6, %v1909_v12  ;;  %v2247_v2 = vld [vmem:[#allocation9 + $0x4] sm:$0xf]  ;;  %v1771_v3 = vld [vmem:[#allocation9 + $0x8] sm:$0xf0] }
 0x120   :  { %v1929_v6 = vld [vmem:[#allocation2 + $0x84] sm:$0xf]  ;;  %v2121_v7 = vld [vmem:[#allocation2 + $0x80] sm:$0xf]  ;;  %v1777_v12 = vld [vmem:[#allocation9 + $0x10] sm:$0xf] }
 0x121   :  { %v393_v17 = vpop.f32.mrf.mxu2  ;;  %v1930_v8 = vor.u32 %v2207_v0, %v1929_v6 }
 0x122   :  { %v482_v18 = vpop.f32.mrf.mxu3 }
 0x123   :  { %v519_v19 = vpack.c.bf16 %v482_v18, %v393_v17  ;;  %v356_v20 = vpop.f32.mrf.mxu0  ;;  %v2102_v17 = vor.u32 %v2186_v9, %v2101_v13  ;;  %v2201_v18 = vld [vmem:[#allocation2 + $0x28] sm:$0xf0]  ;;  %v2122_v9 = vor.u32 %v2191_v1, %v2121_v7  ;;  %v2250_v13 = vld [vmem:[#allocation9 + $0x14] sm:$0xf0] }
 0x124   :  { %v445_v21 = vpop.f32.mrf.mxu1  ;;  %v1953_v59 = vld [vmem:[#allocation2 + $0xe4] sm:$0xf]  ;;  %v2145_v60 = vld [vmem:[#allocation2 + $0xe0] sm:$0xf] }
 0x125   :  { %551 = vst [vmem:[#allocation2 + $0xe8] sm:$0xff] %v519_v19  ;;  %v504_v22 = vpack.c.bf16 %v445_v21, %v356_v20  ;;  %v1945_v19 = vld [vmem:[#allocation2 + $0xc4] sm:$0xf]  ;;  %v2137_v20 = vld [vmem:[#allocation2 + $0xc0] sm:$0xf] }
 0x126   :  { %v2205_v38 = vld [vmem:[#allocation2 + $0x68] sm:$0xf0]  ;;  %v2189_v39 = vld [vmem:[#allocation2 + $0x64] sm:$0xf0] }
 0x127   :  { %536 = vst [vmem:[#allocation2 + $0x70] sm:$0xff] %v504_v22  ;;  %v1922_v42 = vor.u32 %v2205_v38, %v1921_v40  ;;  %v2114_v43 = vor.u32 %v2189_v39, %v2113_v41  ;;  %v2185_v21 = vld [vmem:[#allocation2 + $0x24] sm:$0xf0]  ;;  %v1946_v22 = vor.u32 %v2211_v14, %v1945_v19  ;;  %v2209_v38 = vld [vmem:[#allocation2 + $0xa8] sm:$0xf0] }
 0x128   :  { %v2193_v39 = vld [vmem:[#allocation2 + $0xa4] sm:$0xf0]  ;;  %v1969_v14 = vld [vmem:[#allocation8 + $0x10] sm:$0xf]  ;;  %v1779_v19 = vld [vmem:[#allocation9 + $0x18] sm:$0xf0] }
 0x129   :  { %v396_v23 = vpop.f32.mrf.mxu2 }
 0x12a   :  { %v485_v24 = vpop.f32.mrf.mxu3 }
 0x12b   :  { %v520_v25 = vpack.c.bf16 %v485_v24, %v396_v23  ;;  %v358_v26 = vpop.f32.mrf.mxu0  ;;  %v2138_v23 = vor.u32 %v2195_v15, %v2137_v20  ;;  %v1905_v24 = vld [vmem:[#allocation2 + $0x24] sm:$0xf]  ;;  %v2218_v15 = vld [vmem:[#allocation8 + $0x14] sm:$0xf0]  ;;  %v2217_v20 = vld [vmem:[#allocation8 + $0x14] sm:$0xf] }
 0x12c   :  { %v447_v27 = vpop.f32.mrf.mxu1  ;;  %v2213_v54 = vld [vmem:[#allocation2 + $0xe8] sm:$0xf0]  ;;  %v2197_v55 = vld [vmem:[#allocation2 + $0xe4] sm:$0xf0] }
 0x12d   :  { %552 = vst [vmem:[#allocation2 + $0xf0] sm:$0xff] %v520_v25  ;;  %v505_v28 = vpack.c.bf16 %v447_v27, %v358_v26  ;;  %v1954_v62 = vor.u32 %v2213_v54, %v1953_v59  ;;  %v2146_v63 = vor.u32 %v2197_v55, %v2145_v60  ;;  %v2097_v25 = vld [vmem:[#allocation2 + $0x20] sm:$0xf]  ;;  %v2210_v26 = vld [vmem:[#allocation2 + $0xb8] sm:$0xf0] }
 0x12e   :  { %v1925_v32 = vld [vmem:[#allocation2 + $0x74] sm:$0xf]  ;;  %v2117_v34 = vld [vmem:[#allocation2 + $0x70] sm:$0xf]  ;;  %v2194_v27 = vld [vmem:[#allocation2 + $0xb4] sm:$0xf0] }
 0x12f   :  { %537 = vst [vmem:[#allocation2 + $0x78] sm:$0xff] %v505_v28  ;;  %v1906_v28 = vor.u32 %v2201_v18, %v1905_v24  ;;  %v2208_v54 = vld [vmem:[#allocation2 + $0x98] sm:$0xf0]  ;;  %v2192_v55 = vld [vmem:[#allocation2 + $0x94] sm:$0xf0] }
 0x130   :  { %v2125_v59 = vld [vmem:[#allocation2 + $0x90] sm:$0xf]  ;;  %v2249_v18 = vld [vmem:[#allocation9 + $0x14] sm:$0xf]  ;;  %v1785_v24 = vld [vmem:[#allocation9 + $0x20] sm:$0xf] }
 0x131   :  { %v398_v29 = vpop.f32.mrf.mxu2 }
 0x132   :  { %v487_v30 = vpop.f32.mrf.mxu3 }
 0x133   :  { %v521_v31 = vpack.c.bf16 %v487_v30, %v398_v29  ;;  %v2098_v29 = vor.u32 %v2185_v21, %v2097_v25  ;;  %v2200_v30 = vld [vmem:[#allocation2 + $0x18] sm:$0xf0]  ;;  %v2252_v25 = vld [vmem:[#allocation9 + $0x24] sm:$0xf0] }
 0x134   :  { %v1957_v44 = vld [vmem:[#allocation2 + $0xf4] sm:$0xf]  ;;  %v2149_v48 = vld [vmem:[#allocation2 + $0xf0] sm:$0xf]  ;;  %v1971_v21 = vld [vmem:[#allocation8 + $0x18] sm:$0xf0] }
 0x135   :  { %553 = vst [vmem:[#allocation2 + $0xf8] sm:$0xff] %v521_v31  ;;  %v1941_v31 = vld [vmem:[#allocation2 + $0xb4] sm:$0xf] }
 0x136   :  { %v2206_v33 = vld [vmem:[#allocation2 + $0x78] sm:$0xf0]  ;;  %v2190_v35 = vld [vmem:[#allocation2 + $0x74] sm:$0xf0] }
 0x137   :  { %v1926_v36 = vor.u32 %v2206_v33, %v1925_v32  ;;  %v2118_v37 = vor.u32 %v2190_v35, %v2117_v34  ;;  %v2133_v32 = vld [vmem:[#allocation2 + $0xb0] sm:$0xf]  ;;  %v2184_v33 = vld [vmem:[#allocation2 + $0x14] sm:$0xf0]  ;;  %v1942_v34 = vor.u32 %v2210_v26, %v1941_v31  ;;  %v1977_v26 = vld [vmem:[#allocation8 + $0x20] sm:$0xf] }
 0x138   :  { %v2134_v35 = vor.u32 %v2194_v27, %v2133_v32  ;;  %v2220_v27 = vld [vmem:[#allocation8 + $0x24] sm:$0xf0]  ;;  %v1787_v31 = vld [vmem:[#allocation9 + $0x28] sm:$0xf0]  ;;  %v2219_v32 = vld [vmem:[#allocation8 + $0x24] sm:$0xf] }
 0x139   :  { %938 = vmatpush.bf16.msrb.mxu2 %v1926_v36  ;;  %1372 = vmatpush.bf16.msrb.mxu0 %v2118_v37  ;;  %v1901_v36 = vld [vmem:[#allocation2 + $0x14] sm:$0xf]  ;;  %v2093_v37 = vld [vmem:[#allocation2 + $0x10] sm:$0xf] }
 0x13a   :  { %v1902_v40 = vor.u32 %v2200_v30, %v1901_v36  ;;  %v2094_v41 = vor.u32 %v2184_v33, %v2093_v37  ;;  %v2251_v30 = vld [vmem:[#allocation9 + $0x24] sm:$0xf]  ;;  %v1979_v33 = vld [vmem:[#allocation8 + $0x28] sm:$0xf0]  ;;  %v1793_v36 = vld [vmem:[#allocation9 + $0x30] sm:$0xf] }
 0x13b   :  { %v2254_v37 = vld [vmem:[#allocation9 + $0x34] sm:$0xf0] }
 0x13c   :  { %v2214_v47 = vld [vmem:[#allocation2 + $0xf8] sm:$0xf0]  ;;  %v2198_v49 = vld [vmem:[#allocation2 + $0xf4] sm:$0xf0] }
 0x13d   :  { %939 = vmatpush.bf16.msrb.mxu2 %v1922_v42  ;;  %1373 = vmatpush.bf16.msrb.mxu0 %v2114_v43  ;;  %v1958_v50 = vor.u32 %v2214_v47, %v1957_v44  ;;  %v2150_v51 = vor.u32 %v2198_v49, %v2149_v48  ;;  %v2199_v42 = vld [vmem:[#allocation2 + $0x8] sm:$0xf0]  ;;  %v2183_v43 = vld [vmem:[#allocation2 + $0x4] sm:$0xf0]  ;;  %v1937_v44 = vld [vmem:[#allocation2 + $0xa4] sm:$0xf]  ;;  %v2130_v49 = vor.u32 %v2193_v39, %v2129_v45 }
 0x13e   :  { %v1769_v47 = vld [vmem:[#allocation9] sm:$0xf]  ;;  %v1938_v48 = vor.u32 %v2209_v38, %v1937_v44  ;;  %v1985_v38 = vld [vmem:[#allocation8 + $0x30] sm:$0xf]  ;;  %v2222_v39 = vld [vmem:[#allocation8 + $0x34] sm:$0xf0] }
 0x13f   :  { %1027 = vmatpush.bf16.msrb.mxu3 %v1958_v50  ;;  %1461 = vmatpush.bf16.msrb.mxu1 %v2150_v51  ;;  %v2248_v50 = vld [vmem:[#allocation9 + $0x4] sm:$0xf0]  ;;  %v1961_v51 = vld [vmem:[#allocation8] sm:$0xf]  ;;  %v2221_v44 = vld [vmem:[#allocation8 + $0x34] sm:$0xf] }
 0x140   :  { %v1770_v60 = vor.u32 %v2248_v50, %v1769_v47  ;;  %v1962_v61 = vor.u32 %v2216_v52, %v1961_v51  ;;  %v1987_v45 = vld [vmem:[#allocation8 + $0x38] sm:$0xf0]  ;;  %v1993_v50 = vld [vmem:[#allocation8 + $0x40] sm:$0xf]  ;;  %v2224_v51 = vld [vmem:[#allocation8 + $0x44] sm:$0xf0] }
 0x141   :  { %940 = vmatpush.bf16.msrb.mxu2 %v1918_v56  ;;  %1374 = vmatpush.bf16.msrb.mxu0 %v2110_v57  ;;  %v1898_v56 = vor.u32 %v2199_v42, %v1897_v46  ;;  %v2090_v57 = vor.u32 %v2183_v43, %v2089_v53  ;;  %v2253_v42 = vld [vmem:[#allocation9 + $0x34] sm:$0xf]  ;;  %v1795_v43 = vld [vmem:[#allocation9 + $0x38] sm:$0xf0]  ;;  %v1990_v47 = vor.u32 %v2221_v44, %v1987_v45 }
 0x142   :  { %v1798_v46 = vor.u32 %v2253_v42, %v1795_v43  ;;  %v1994_v53 = vor.u32 %v2224_v51, %v1993_v50  ;;  %v2027_v42 = vld [vmem:[#allocation8 + $0x88] sm:$0xf0]  ;;  %v2266_v50 = vld [vmem:[#allocation9 + $0x94] sm:$0xf0]  ;;  %v2033_v51 = vld [vmem:[#allocation8 + $0x90] sm:$0xf] }
 0x143   :  { %1028 = vmatpush.bf16.msrb.mxu3 %v1954_v62  ;;  %1462 = vmatpush.bf16.msrb.mxu1 %v2146_v63  ;;  %v1934_v62 = vor.u32 %v2208_v54, %v1933_v58  ;;  %v2126_v63 = vor.u32 %v2192_v55, %v2125_v59  ;;  %v2255_v54 = vld [vmem:[#allocation9 + $0x44] sm:$0xf]  ;;  %v1803_v55 = vld [vmem:[#allocation9 + $0x48] sm:$0xf0] }
 0x144   :  { %v1806_v58 = vor.u32 %v2255_v54, %v1803_v55 }
 0x145   :  { %941 = vmatpush.bf16.msrb.mxu2 %v1914_v4  ;;  %1375 = vmatpush.bf16.msrb.mxu0 %v2106_v5  ;;  %v2215_v4 = vld [vmem:[#allocation8 + $0x4] sm:$0xf]  ;;  %v1963_v5 = vld [vmem:[#allocation8 + $0x8] sm:$0xf0] }
 0x147   :  { %1029 = vmatpush.bf16.msrb.mxu3 %v1950_v10  ;;  %1463 = vmatpush.bf16.msrb.mxu1 %v2142_v11  ;;  %v1774_v10 = vor.u32 %v2247_v2, %v1771_v3  ;;  %v1966_v11 = vor.u32 %v2215_v4, %v1963_v5  ;;  %v2257_v2 = vld [vmem:[#allocation9 + $0x54] sm:$0xf]  ;;  %v1811_v3 = vld [vmem:[#allocation9 + $0x58] sm:$0xf0] }
 0x148   :  { %v2225_v4 = vld [vmem:[#allocation8 + $0x54] sm:$0xf]  ;;  %v2003_v5 = vld [vmem:[#allocation8 + $0x58] sm:$0xf0]  ;;  %v1814_v6 = vor.u32 %v2257_v2, %v1811_v3 }
 0x149   :  { %942 = vmatpush.bf16.msrb.mxu2 %v1910_v16  ;;  %1376 = vmatpush.bf16.msrb.mxu0 %v2102_v17  ;;  %v1778_v16 = vor.u32 %v2250_v13, %v1777_v12  ;;  %v1970_v17 = vor.u32 %v2218_v15, %v1969_v14  ;;  %v2006_v7 = vor.u32 %v2225_v4, %v2003_v5  ;;  %v2259_v14 = vld [vmem:[#allocation9 + $0x64] sm:$0xf]  ;;  %v1819_v15 = vld [vmem:[#allocation9 + $0x68] sm:$0xf0] }
 0x14b   :  { %1030 = vmatpush.bf16.msrb.mxu3 %v1946_v22  ;;  %1464 = vmatpush.bf16.msrb.mxu1 %v2138_v23  ;;  %v1782_v22 = vor.u32 %v2249_v18, %v1779_v19  ;;  %v1974_v23 = vor.u32 %v2217_v20, %v1971_v21  ;;  %v1822_v18 = vor.u32 %v2259_v14, %v1819_v15  ;;  %v1825_v20 = vld [vmem:[#allocation9 + $0x70] sm:$0xf]  ;;  %v2262_v21 = vld [vmem:[#allocation9 + $0x74] sm:$0xf0]  ;;  %v2268_v15 = vld [vmem:[#allocation9 + $0xa4] sm:$0xf0] }
 0x14d   :  { %943 = vmatpush.bf16.msrb.mxu2 %v1906_v28  ;;  %1377 = vmatpush.bf16.msrb.mxu0 %v2098_v29  ;;  %v1786_v28 = vor.u32 %v2252_v25, %v1785_v24  ;;  %v1978_v29 = vor.u32 %v2220_v27, %v1977_v26  ;;  %v1826_v24 = vor.u32 %v2262_v21, %v1825_v20  ;;  %v2261_v26 = vld [vmem:[#allocation9 + $0x74] sm:$0xf]  ;;  %v1827_v27 = vld [vmem:[#allocation9 + $0x78] sm:$0xf0] }
 0x14f   :  { %1031 = vmatpush.bf16.msrb.mxu3 %v1942_v34  ;;  %1465 = vmatpush.bf16.msrb.mxu1 %v2134_v35  ;;  %v1790_v34 = vor.u32 %v2251_v30, %v1787_v31  ;;  %v1982_v35 = vor.u32 %v2219_v32, %v1979_v33  ;;  %v1830_v30 = vor.u32 %v2261_v26, %v1827_v27  ;;  %v1833_v32 = vld [vmem:[#allocation9 + $0x80] sm:$0xf]  ;;  %v2264_v33 = vld [vmem:[#allocation9 + $0x84] sm:$0xf0]  ;;  %v2267_v26 = vld [vmem:[#allocation9 + $0xa4] sm:$0xf] }
 0x150   :  { %v1851_v27 = vld [vmem:[#allocation9 + $0xa8] sm:$0xf0] }
 0x151   :  { %944 = vmatpush.bf16.msrb.mxu2 %v1902_v40  ;;  %1378 = vmatpush.bf16.msrb.mxu0 %v2094_v41  ;;  %v1794_v40 = vor.u32 %v2254_v37, %v1793_v36  ;;  %v1986_v41 = vor.u32 %v2222_v39, %v1985_v38  ;;  %v1834_v36 = vor.u32 %v2264_v33, %v1833_v32  ;;  %v2263_v39 = vld [vmem:[#allocation9 + $0x84] sm:$0xf] }
 0x152   :  { %v1854_v33 = vor.u32 %v2267_v26, %v1851_v27 }
 0x153   :  { %1032 = vmatpush.bf16.msrb.mxu3 %v1938_v48  ;;  %1466 = vmatpush.bf16.msrb.mxu1 %v2130_v49  ;;  %v1801_v48 = vld [vmem:[#allocation9 + $0x40] sm:$0xf]  ;;  %v2256_v49 = vld [vmem:[#allocation9 + $0x44] sm:$0xf0] }
 0x154   :  { %v1802_v52 = vor.u32 %v2256_v49, %v1801_v48  ;;  %v1841_v48 = vld [vmem:[#allocation9 + $0x90] sm:$0xf] }
 0x155   :  { %945 = vmatpush.bf16.msrb.mxu2 %v1898_v56  ;;  %1379 = vmatpush.bf16.msrb.mxu0 %v2090_v57  ;;  %v2223_v56 = vld [vmem:[#allocation8 + $0x44] sm:$0xf]  ;;  %v1995_v57 = vld [vmem:[#allocation8 + $0x48] sm:$0xf0] }
 0x156   :  { %v1998_v59 = vor.u32 %v2223_v56, %v1995_v57  ;;  %v2496_v57 = vld [vmem:[%s2540_s4] ss:$0 sm:$0xff]  ;;  %s2441_s4 = smov [#allocation11]  }
 0x157   :  { %1033 = vmatpush.bf16.msrb.mxu3 %v1934_v62  ;;  %1467 = vmatpush.bf16.msrb.mxu1 %v2126_v63  ;;  %v2001_v62 = vld [vmem:[#allocation8 + $0x50] sm:$0xf]  ;;  %v2226_v63 = vld [vmem:[#allocation8 + $0x54] sm:$0xf0]  ;;  %s1622_s15 = sshll.u32 %s2441_s4, 4  ;;  %s1623_s15 = int_to_ptr.vmem [resolvable:$true] %s1622_s15 }
 0x158   :  { %946 = vmatmul.bf16.vlgmr.msrb.gmra.mxu2 %v1770_v60  ;;  %1380 = vmatmul.bf16.vlgmr.msrb.gmra.mxu0 %v1962_v61  ;;  %v1809_v60 = vld [vmem:[#allocation9 + $0x50] sm:$0xf]  ;;  %v2258_v61 = vld [vmem:[#allocation9 + $0x54] sm:$0xf0]  ;;  %v2002_v1 = vor.u32 %v2226_v63, %v2001_v62  ;;  %v2265_v62 = vld [vmem:[#allocation9 + $0x94] sm:$0xf] }
 0x159   :  { %v1810_v0 = vor.u32 %v2258_v61, %v1809_v60  ;;  %v1843_v63 = vld [vmem:[#allocation9 + $0x98] sm:$0xf0] }
 0x15a   :  { %v1846_v5 = vor.u32 %v2265_v62, %v1843_v63 }
 0x15b   :  { %1034 = vmatpush.bf16.msrb.mxu3 %v1930_v8  ;;  %1468 = vmatpush.bf16.msrb.mxu1 %v2122_v9  ;;  %v1817_v8 = vld [vmem:[#allocation9 + $0x60] sm:$0xf]  ;;  %v2260_v9 = vld [vmem:[#allocation9 + $0x64] sm:$0xf0] }
 0x15c   :  { %v1818_v12 = vor.u32 %v2260_v9, %v1817_v8 }
 0x15e   :  { %1035 = vmatmul.bf16.vlgmr.msrb.gmra.mxu3 %v1774_v10  ;;  %1469 = vmatmul.bf16.vlgmr.msrb.gmra.mxu1 %v1966_v11  ;;  %v2009_v10 = vld [vmem:[#allocation8 + $0x60] sm:$0xf]  ;;  %v2228_v11 = vld [vmem:[#allocation8 + $0x64] sm:$0xf0] }
 0x15f   :  { %v2010_v13 = vor.u32 %v2228_v11, %v2009_v10 }
 0x168   :  { %951 = vmatmul.bf16.gmra.mxu2 %v1778_v16  ;;  %1385 = vmatmul.bf16.gmra.mxu0 %v1970_v17  ;;  %v2227_v16 = vld [vmem:[#allocation8 + $0x64] sm:$0xf]  ;;  %v2011_v17 = vld [vmem:[#allocation8 + $0x68] sm:$0xf0] }
 0x169   :  { %v2014_v19 = vor.u32 %v2227_v16, %v2011_v17  ;;  %v2041_v16 = vld [vmem:[#allocation8 + $0xa0] sm:$0xf]  ;;  %v2236_v17 = vld [vmem:[#allocation8 + $0xa4] sm:$0xf0] }
 0x16e   :  { %1040 = vmatmul.bf16.gmra.mxu3 %v1782_v22  ;;  %1474 = vmatmul.bf16.gmra.mxu1 %v1974_v23  ;;  %v2017_v22 = vld [vmem:[#allocation8 + $0x70] sm:$0xf]  ;;  %v2230_v23 = vld [vmem:[#allocation8 + $0x74] sm:$0xf0] }
 0x16f   :  { %v2018_v25 = vor.u32 %v2230_v23, %v2017_v22  ;;  %v2042_v23 = vor.u32 %v2236_v17, %v2041_v16 }
 0x178   :  { %956 = vmatmul.bf16.gmra.mxu2 %v1786_v28  ;;  %1390 = vmatmul.bf16.gmra.mxu0 %v1978_v29  ;;  %v2229_v28 = vld [vmem:[#allocation8 + $0x74] sm:$0xf]  ;;  %v2019_v29 = vld [vmem:[#allocation8 + $0x78] sm:$0xf0] }
 0x179   :  { %v2022_v31 = vor.u32 %v2229_v28, %v2019_v29  ;;  %v2235_v28 = vld [vmem:[#allocation8 + $0xa4] sm:$0xf]  ;;  %v2043_v29 = vld [vmem:[#allocation8 + $0xa8] sm:$0xf0] }
 0x17e   :  { %1045 = vmatmul.bf16.gmra.mxu3 %v1790_v34  ;;  %1479 = vmatmul.bf16.gmra.mxu1 %v1982_v35  ;;  %v2025_v34 = vld [vmem:[#allocation8 + $0x80] sm:$0xf]  ;;  %v2232_v35 = vld [vmem:[#allocation8 + $0x84] sm:$0xf0] }
 0x17f   :  { %v2026_v37 = vor.u32 %v2232_v35, %v2025_v34  ;;  %v2046_v34 = vor.u32 %v2235_v28, %v2043_v29 }
 0x188   :  { %961 = vmatmul.bf16.gmra.mxu2 %v1794_v40  ;;  %1395 = vmatmul.bf16.gmra.mxu0 %v1986_v41  ;;  %v1835_v40 = vld [vmem:[#allocation9 + $0x88] sm:$0xf0]  ;;  %v2231_v41 = vld [vmem:[#allocation8 + $0x84] sm:$0xf] }
 0x189   :  { %v1838_v43 = vor.u32 %v2263_v39, %v1835_v40  ;;  %v2030_v44 = vor.u32 %v2231_v41, %v2027_v42  ;;  %v1857_v41 = vld [vmem:[#allocation9 + $0xb0] sm:$0xf] }
 0x18e   :  { %1050 = vmatmul.bf16.gmra.mxu3 %v1798_v46  ;;  %1484 = vmatmul.bf16.gmra.mxu1 %v1990_v47 }
 0x198   :  { %966 = vmatmul.bf16.gmra.mxu2 %v1802_v52  ;;  %1400 = vmatmul.bf16.gmra.mxu0 %v1994_v53  ;;  %v2234_v52 = vld [vmem:[#allocation8 + $0x94] sm:$0xf0] }
 0x19e   :  { %1055 = vmatmul.bf16.gmra.mxu3 %v1806_v58  ;;  %1489 = vmatmul.bf16.gmra.mxu1 %v1998_v59  ;;  %v1842_v58 = vor.u32 %v2266_v50, %v1841_v48  ;;  %v2034_v59 = vor.u32 %v2234_v52, %v2033_v51 }
 0x1a8   :  { %971 = vmatmul.bf16.gmra.mxu2 %v1810_v0  ;;  %1405 = vmatmul.bf16.gmra.mxu0 %v2002_v1  ;;  %v2233_v0 = vld [vmem:[#allocation8 + $0x94] sm:$0xf]  ;;  %v2035_v1 = vld [vmem:[#allocation8 + $0x98] sm:$0xf0] }
 0x1ae   :  { %1060 = vmatmul.bf16.gmra.mxu3 %v1814_v6  ;;  %1494 = vmatmul.bf16.gmra.mxu1 %v2006_v7  ;;  %v2038_v6 = vor.u32 %v2233_v0, %v2035_v1 }
 0x1b8   :  { %976 = vmatmul.bf16.gmra.mxu2 %v1818_v12  ;;  %1410 = vmatmul.bf16.gmra.mxu0 %v2010_v13  ;;  %v1849_v13 = vld [vmem:[#allocation9 + $0xa0] sm:$0xf] }
 0x1b9   :  { %v1850_v22 = vor.u32 %v2268_v15, %v1849_v13 }
 0x1be   :  { %1065 = vmatmul.bf16.gmra.mxu3 %v1822_v18  ;;  %1499 = vmatmul.bf16.gmra.mxu1 %v2014_v19 }
 0x1c8   :  { %981 = vmatmul.bf16.gmra.mxu2 %v1826_v24  ;;  %1415 = vmatmul.bf16.gmra.mxu0 %v2018_v25 }
 0x1ce   :  { %1070 = vmatmul.bf16.gmra.mxu3 %v1830_v30  ;;  %1504 = vmatmul.bf16.gmra.mxu1 %v2022_v31 }
 0x1d5   :  { %v1381_v38 = vpop.f32.mrf.mxu0 }
 0x1d8   :  { %986 = vmatmul.bf16.gmra.mxu2 %v1834_v36  ;;  %1420 = vmatmul.bf16.gmra.mxu0 %v2026_v37 }
 0x1db   :  { %v947_v45 = vpop.f32.mrf.mxu2  ;;  %v1470_v46 = vpop.f32.mrf.mxu1 }
 0x1dd   :  { %v1383_v47 = vpop.f32.mrf.mxu0 }
 0x1de   :  { %1075 = vmatmul.bf16.gmra.mxu3 %v1838_v43  ;;  %1509 = vmatmul.bf16.gmra.mxu1 %v2030_v44  ;;  %v2270_v43 = vld [vmem:[#allocation9 + $0xb4] sm:$0xf0]  ;;  %v2049_v44 = vld [vmem:[#allocation8 + $0xb0] sm:$0xf] }
 0x1df   :  { %v1858_v50 = vor.u32 %v2270_v43, %v1857_v41 }
 0x1e1   :  { %v1036_v49 = vpop.f32.mrf.mxu3 }
 0x1e2   :  { %v1037_v53 = vadd.f32 %v1036_v49, %v947_v45  ;;  %v2238_v45 = vld [vmem:[#allocation8 + $0xb4] sm:$0xf0] }
 0x1e3   :  { %v949_v54 = vpop.f32.mrf.mxu2  ;;  %v1472_v55 = vpop.f32.mrf.mxu1  ;;  %v2050_v51 = vor.u32 %v2238_v45, %v2049_v44 }
 0x1e4   :  { %v1382_v56 = vadd.f32 %v1381_v38, %v1037_v53 }
 0x1e5   :  { %v1386_v60 = vpop.f32.mrf.mxu0 }
 0x1e6   :  { %v1471_v61 = vadd.f32 %v1470_v46, %v1382_v56  ;;  %v2237_v56 = vld [vmem:[#allocation8 + $0xb4] sm:$0xf] }
 0x1e8   :  { %v1554_v2 = vadd.f32 %v2496_v57, %v1471_v61  ;;  %991 = vmatmul.bf16.gmra.mxu2 %v1842_v58  ;;  %1425 = vmatmul.bf16.gmra.mxu0 %v2034_v59  ;;  %v2051_v58 = vld [vmem:[#allocation8 + $0xb8] sm:$0xf0] }
 0x1e9   :  { %v1038_v3 = vpop.f32.mrf.mxu3  ;;  %v2054_v63 = vor.u32 %v2237_v56, %v2051_v58 }
 0x1ea   :  { %1586 = vst [vmem:[#allocation11] sm:$0xff] %v1554_v2  ;;  %v1039_v4 = vadd.f32 %v1038_v3, %v949_v54  ;;  %v2269_v54 = vld [vmem:[#allocation9 + $0xb4] sm:$0xf] }
 0x1eb   :  { %v952_v7 = vpop.f32.mrf.mxu2  ;;  %v1475_v8 = vpop.f32.mrf.mxu1 }
 0x1ec   :  { %v1384_v9 = vadd.f32 %v1383_v47, %v1039_v4 }
 0x1ed   :  { %v1388_v10 = vpop.f32.mrf.mxu0 }
 0x1ee   :  { %v1473_v11 = vadd.f32 %v1472_v55, %v1384_v9  ;;  %1080 = vmatmul.bf16.gmra.mxu3 %v1846_v5  ;;  %1514 = vmatmul.bf16.gmra.mxu1 %v2038_v6  ;;  %v1859_v55 = vld [vmem:[#allocation9 + $0xb8] sm:$0xf0]  ;;  %v1865_v6 = vld [vmem:[#allocation9 + $0xc0] sm:$0xf] }
 0x1ef   :  { %v1862_v62 = vor.u32 %v2269_v54, %v1859_v55  ;;  %v2057_v9 = vld [vmem:[#allocation8 + $0xc0] sm:$0xf] }
 0x1f0   :  { %v1555_v12 = vadd.f32 %v2496_v57, %v1473_v11 }
 0x1f1   :  { %v1041_v14 = vpop.f32.mrf.mxu3 }
 0x1f2   :  { %1587 = vst [vmem:[#allocation11 + $0x8] sm:$0xff] %v1555_v12  ;;  %v1042_v18 = vadd.f32 %v1041_v14, %v952_v7 }
 0x1f3   :  { %v954_v19 = vpop.f32.mrf.mxu2  ;;  %v1477_v20 = vpop.f32.mrf.mxu1 }
 0x1f4   :  { %v1387_v21 = vadd.f32 %v1386_v60, %v1042_v18 }
 0x1f5   :  { %v1391_v24 = vpop.f32.mrf.mxu0 }
 0x1f6   :  { %v1476_v25 = vadd.f32 %v1475_v8, %v1387_v21  ;;  %v2272_v8 = vld [vmem:[#allocation9 + $0xc4] sm:$0xf0]  ;;  %v2239_v21 = vld [vmem:[#allocation8 + $0xc4] sm:$0xf] }
 0x1f7   :  { %v1866_v15 = vor.u32 %v2272_v8, %v1865_v6 }
 0x1f8   :  { %v1556_v30 = vadd.f32 %v2496_v57, %v1476_v25  ;;  %996 = vmatmul.bf16.gmra.mxu2 %v1850_v22  ;;  %1430 = vmatmul.bf16.gmra.mxu0 %v2042_v23  ;;  %v2059_v22 = vld [vmem:[#allocation8 + $0xc8] sm:$0xf0] }
 0x1f9   :  { %v1043_v31 = vpop.f32.mrf.mxu3  ;;  %v2062_v27 = vor.u32 %v2239_v21, %v2059_v22 }
 0x1fa   :  { %1588 = vst [vmem:[#allocation11 + $0x10] sm:$0xff] %v1556_v30  ;;  %v1044_v32 = vadd.f32 %v1043_v31, %v954_v19  ;;  %v2271_v19 = vld [vmem:[#allocation9 + $0xc4] sm:$0xf] }
 0x1fb   :  { %v957_v35 = vpop.f32.mrf.mxu2  ;;  %v1480_v36 = vpop.f32.mrf.mxu1 }
 0x1fc   :  { %v1389_v37 = vadd.f32 %v1388_v10, %v1044_v32  ;;  %v2240_v10 = vld [vmem:[#allocation8 + $0xc4] sm:$0xf0] }
 0x1fd   :  { %v1393_v38 = vpop.f32.mrf.mxu0  ;;  %v2058_v16 = vor.u32 %v2240_v10, %v2057_v9 }
 0x1fe   :  { %v1478_v39 = vadd.f32 %v1477_v20, %v1389_v37  ;;  %1085 = vmatmul.bf16.gmra.mxu3 %v1854_v33  ;;  %1519 = vmatmul.bf16.gmra.mxu1 %v2046_v34  ;;  %v1867_v20 = vld [vmem:[#allocation9 + $0xc8] sm:$0xf0]  ;;  %v1873_v34 = vld [vmem:[#allocation9 + $0xd0] sm:$0xf] }
 0x1ff   :  { %v1870_v26 = vor.u32 %v2271_v19, %v1867_v20  ;;  %v2065_v37 = vld [vmem:[#allocation8 + $0xd0] sm:$0xf] }
 0x200   :  { %v1557_v40 = vadd.f32 %v2496_v57, %v1478_v39 }
 0x201   :  { %v1046_v42 = vpop.f32.mrf.mxu3 }
 0x202   :  { %1589 = vst [vmem:[#allocation11 + $0x18] sm:$0xff] %v1557_v40  ;;  %v1047_v46 = vadd.f32 %v1046_v42, %v957_v35 }
 0x203   :  { %v959_v47 = vpop.f32.mrf.mxu2  ;;  %v1482_v48 = vpop.f32.mrf.mxu1 }
 0x204   :  { %v1392_v49 = vadd.f32 %v1391_v24, %v1047_v46 }
 0x205   :  { %v1396_v52 = vpop.f32.mrf.mxu0 }
 0x206   :  { %v1481_v53 = vadd.f32 %v1480_v36, %v1392_v49  ;;  %v2274_v36 = vld [vmem:[#allocation9 + $0xd4] sm:$0xf0]  ;;  %v2241_v49 = vld [vmem:[#allocation8 + $0xd4] sm:$0xf] }
 0x207   :  { %v1874_v43 = vor.u32 %v2274_v36, %v1873_v34 }
 0x208   :  { %v1558_v59 = vadd.f32 %v2496_v57, %v1481_v53  ;;  %1001 = vmatmul.bf16.gmra.mxu2 %v1858_v50  ;;  %1435 = vmatmul.bf16.gmra.mxu0 %v2050_v51  ;;  %v2067_v50 = vld [vmem:[#allocation8 + $0xd8] sm:$0xf0] }
 0x209   :  { %v1048_v60 = vpop.f32.mrf.mxu3  ;;  %v2070_v55 = vor.u32 %v2241_v49, %v2067_v50 }
 0x20a   :  { %1590 = vst [vmem:[#allocation11 + $0x20] sm:$0xff] %v1558_v59  ;;  %v1049_v61 = vadd.f32 %v1048_v60, %v959_v47  ;;  %v2273_v47 = vld [vmem:[#allocation9 + $0xd4] sm:$0xf] }
 0x20b   :  { %v962_v0 = vpop.f32.mrf.mxu2  ;;  %v1485_v1 = vpop.f32.mrf.mxu1 }
 0x20c   :  { %v1394_v2 = vadd.f32 %v1393_v38, %v1049_v61  ;;  %v2242_v38 = vld [vmem:[#allocation8 + $0xd4] sm:$0xf0] }
 0x20d   :  { %v1398_v3 = vpop.f32.mrf.mxu0  ;;  %v2066_v44 = vor.u32 %v2242_v38, %v2065_v37 }
 0x20e   :  { %v1483_v4 = vadd.f32 %v1482_v48, %v1394_v2  ;;  %1090 = vmatmul.bf16.gmra.mxu3 %v1862_v62  ;;  %1524 = vmatmul.bf16.gmra.mxu1 %v2054_v63  ;;  %v1875_v48 = vld [vmem:[#allocation9 + $0xd8] sm:$0xf0]  ;;  %v1881_v63 = vld [vmem:[#allocation9 + $0xe0] sm:$0xf] }
 0x20f   :  { %v1878_v54 = vor.u32 %v2273_v47, %v1875_v48  ;;  %v2073_v2 = vld [vmem:[#allocation8 + $0xe0] sm:$0xf] }
 0x210   :  { %v1559_v5 = vadd.f32 %v2496_v57, %v1483_v4 }
 0x211   :  { %v1051_v7 = vpop.f32.mrf.mxu3 }
 0x212   :  { %1591 = vst [vmem:[#allocation11 + $0x28] sm:$0xff] %v1559_v5  ;;  %v1052_v11 = vadd.f32 %v1051_v7, %v962_v0 }
 0x213   :  { %v964_v12 = vpop.f32.mrf.mxu2  ;;  %v1487_v13 = vpop.f32.mrf.mxu1 }
 0x214   :  { %v1397_v14 = vadd.f32 %v1396_v52, %v1052_v11 }
 0x215   :  { %v1401_v17 = vpop.f32.mrf.mxu0 }
 0x216   :  { %v1486_v18 = vadd.f32 %v1485_v1, %v1397_v14  ;;  %v2276_v1 = vld [vmem:[#allocation9 + $0xe4] sm:$0xf0]  ;;  %v2243_v14 = vld [vmem:[#allocation8 + $0xe4] sm:$0xf] }
 0x217   :  { %v1882_v8 = vor.u32 %v2276_v1, %v1881_v63 }
 0x218   :  { %v1560_v23 = vadd.f32 %v2496_v57, %v1486_v18  ;;  %1006 = vmatmul.bf16.gmra.mxu2 %v1866_v15  ;;  %1440 = vmatmul.bf16.gmra.mxu0 %v2058_v16  ;;  %v2075_v15 = vld [vmem:[#allocation8 + $0xe8] sm:$0xf0] }
 0x219   :  { %v1053_v24 = vpop.f32.mrf.mxu3  ;;  %v2078_v20 = vor.u32 %v2243_v14, %v2075_v15 }
 0x21a   :  { %1592 = vst [vmem:[#allocation11 + $0x30] sm:$0xff] %v1560_v23  ;;  %v1054_v25 = vadd.f32 %v1053_v24, %v964_v12  ;;  %v2275_v12 = vld [vmem:[#allocation9 + $0xe4] sm:$0xf] }
 0x21b   :  { %v967_v28 = vpop.f32.mrf.mxu2  ;;  %v1490_v29 = vpop.f32.mrf.mxu1 }
 0x21c   :  { %v1399_v30 = vadd.f32 %v1398_v3, %v1054_v25  ;;  %v2244_v3 = vld [vmem:[#allocation8 + $0xe4] sm:$0xf0] }
 0x21d   :  { %v1403_v31 = vpop.f32.mrf.mxu0  ;;  %v2074_v9 = vor.u32 %v2244_v3, %v2073_v2 }
 0x21e   :  { %v1488_v32 = vadd.f32 %v1487_v13, %v1399_v30  ;;  %1095 = vmatmul.bf16.gmra.mxu3 %v1870_v26  ;;  %1529 = vmatmul.bf16.gmra.mxu1 %v2062_v27  ;;  %v1883_v13 = vld [vmem:[#allocation9 + $0xe8] sm:$0xf0]  ;;  %v1889_v27 = vld [vmem:[#allocation9 + $0xf0] sm:$0xf] }
 0x21f   :  { %v1886_v19 = vor.u32 %v2275_v12, %v1883_v13  ;;  %v2081_v30 = vld [vmem:[#allocation8 + $0xf0] sm:$0xf] }
 0x220   :  { %v1561_v33 = vadd.f32 %v2496_v57, %v1488_v32 }
 0x221   :  { %v1056_v35 = vpop.f32.mrf.mxu3 }
 0x222   :  { %1593 = vst [vmem:[#allocation11 + $0x38] sm:$0xff] %v1561_v33  ;;  %v1057_v39 = vadd.f32 %v1056_v35, %v967_v28 }
 0x223   :  { %v969_v40 = vpop.f32.mrf.mxu2  ;;  %v1492_v41 = vpop.f32.mrf.mxu1 }
 0x224   :  { %v1402_v42 = vadd.f32 %v1401_v17, %v1057_v39 }
 0x225   :  { %v1406_v45 = vpop.f32.mrf.mxu0 }
 0x226   :  { %v1491_v46 = vadd.f32 %v1490_v29, %v1402_v42  ;;  %v2278_v29 = vld [vmem:[#allocation9 + $0xf4] sm:$0xf0]  ;;  %v2245_v42 = vld [vmem:[#allocation8 + $0xf4] sm:$0xf] }
 0x227   :  { %v1890_v36 = vor.u32 %v2278_v29, %v1889_v27 }
 0x228   :  { %v1562_v51 = vadd.f32 %v2496_v57, %v1491_v46  ;;  %1011 = vmatmul.bf16.gmra.mxu2 %v1874_v43  ;;  %1445 = vmatmul.bf16.gmra.mxu0 %v2066_v44  ;;  %v2083_v43 = vld [vmem:[#allocation8 + $0xf8] sm:$0xf0] }
 0x229   :  { %v1058_v52 = vpop.f32.mrf.mxu3  ;;  %v2086_v48 = vor.u32 %v2245_v42, %v2083_v43 }
 0x22a   :  { %1594 = vst [vmem:[#allocation11 + $0x40] sm:$0xff] %v1562_v51  ;;  %v1059_v53 = vadd.f32 %v1058_v52, %v969_v40  ;;  %v2277_v40 = vld [vmem:[#allocation9 + $0xf4] sm:$0xf] }
 0x22b   :  { %v972_v56 = vpop.f32.mrf.mxu2  ;;  %v1495_v58 = vpop.f32.mrf.mxu1 }
 0x22c   :  { %v1404_v59 = vadd.f32 %v1403_v31, %v1059_v53  ;;  %v2246_v31 = vld [vmem:[#allocation8 + $0xf4] sm:$0xf0] }
 0x22d   :  { %v1408_v60 = vpop.f32.mrf.mxu0  ;;  %v2082_v37 = vor.u32 %v2246_v31, %v2081_v30 }
 0x22e   :  { %v1493_v61 = vadd.f32 %v1492_v41, %v1404_v59  ;;  %1100 = vmatmul.bf16.gmra.mxu3 %v1878_v54  ;;  %1534 = vmatmul.bf16.gmra.mxu1 %v2070_v55  ;;  %v1891_v41 = vld [vmem:[#allocation9 + $0xf8] sm:$0xf0] }
 0x22f   :  { %v1894_v47 = vor.u32 %v2277_v40, %v1891_v41 }
 0x230   :  { %v1563_v62 = vadd.f32 %v2496_v57, %v1493_v61 }
 0x231   :  { %v1061_v0 = vpop.f32.mrf.mxu3 }
 0x232   :  { %1595 = vst [vmem:[#allocation11 + $0x48] sm:$0xff] %v1563_v62  ;;  %v1062_v4 = vadd.f32 %v1061_v0, %v972_v56 }
 0x233   :  { %v974_v5 = vpop.f32.mrf.mxu2  ;;  %v1497_v6 = vpop.f32.mrf.mxu1 }
 0x234   :  { %v1407_v7 = vadd.f32 %v1406_v45, %v1062_v4 }
 0x235   :  { %v1411_v10 = vpop.f32.mrf.mxu0 }
 0x236   :  { %v1496_v11 = vadd.f32 %v1495_v58, %v1407_v7 }
 0x238   :  { %v1564_v16 = vadd.f32 %v2496_v57, %v1496_v11  ;;  %1016 = vmatmul.bf16.gmra.mxu2 %v1882_v8  ;;  %1450 = vmatmul.bf16.gmra.mxu0 %v2074_v9 }
 0x239   :  { %v1063_v17 = vpop.f32.mrf.mxu3 }
 0x23a   :  { %1596 = vst [vmem:[#allocation11 + $0x50] sm:$0xff] %v1564_v16  ;;  %v1064_v18 = vadd.f32 %v1063_v17, %v974_v5 }
 0x23b   :  { %v977_v21 = vpop.f32.mrf.mxu2  ;;  %v1500_v22 = vpop.f32.mrf.mxu1 }
 0x23c   :  { %v1409_v23 = vadd.f32 %v1408_v60, %v1064_v18 }
 0x23d   :  { %v1413_v24 = vpop.f32.mrf.mxu0 }
 0x23e   :  { %v1498_v25 = vadd.f32 %v1497_v6, %v1409_v23  ;;  %1105 = vmatmul.bf16.gmra.mxu3 %v1886_v19  ;;  %1539 = vmatmul.bf16.gmra.mxu1 %v2078_v20 }
 0x240   :  { %v1565_v26 = vadd.f32 %v2496_v57, %v1498_v25 }
 0x241   :  { %v1066_v28 = vpop.f32.mrf.mxu3 }
 0x242   :  { %1597 = vst [vmem:[#allocation11 + $0x58] sm:$0xff] %v1565_v26  ;;  %v1067_v32 = vadd.f32 %v1066_v28, %v977_v21 }
 0x243   :  { %v979_v33 = vpop.f32.mrf.mxu2  ;;  %v1502_v34 = vpop.f32.mrf.mxu1 }
 0x244   :  { %v1412_v35 = vadd.f32 %v1411_v10, %v1067_v32 }
 0x245   :  { %v1416_v38 = vpop.f32.mrf.mxu0 }
 0x246   :  { %v1501_v39 = vadd.f32 %v1500_v22, %v1412_v35 }
 0x248   :  { %v1566_v44 = vadd.f32 %v2496_v57, %v1501_v39  ;;  %1021 = vmatmul.bf16.gmra.mxu2 %v1890_v36  ;;  %1455 = vmatmul.bf16.gmra.mxu0 %v2082_v37 }
 0x249   :  { %v1068_v45 = vpop.f32.mrf.mxu3 }
 0x24a   :  { %1598 = vst [vmem:[#allocation11 + $0x60] sm:$0xff] %v1566_v44  ;;  %v1069_v46 = vadd.f32 %v1068_v45, %v979_v33 }
 0x24b   :  { %v982_v49 = vpop.f32.mrf.mxu2  ;;  %v1505_v50 = vpop.f32.mrf.mxu1 }
 0x24c   :  { %v1414_v51 = vadd.f32 %v1413_v24, %v1069_v46 }
 0x24d   :  { %v1418_v52 = vpop.f32.mrf.mxu0 }
 0x24e   :  { %v1503_v53 = vadd.f32 %v1502_v34, %v1414_v51  ;;  %1110 = vmatmul.bf16.gmra.mxu3 %v1894_v47  ;;  %1544 = vmatmul.bf16.gmra.mxu1 %v2086_v48 }
 0x250   :  { %v1567_v54 = vadd.f32 %v2496_v57, %v1503_v53 }
 0x251   :  { %v1071_v55 = vpop.f32.mrf.mxu3 }
 0x252   :  { %1599 = vst [vmem:[#allocation11 + $0x68] sm:$0xff] %v1567_v54  ;;  %v1072_v56 = vadd.f32 %v1071_v55, %v982_v49 }
 0x253   :  { %v984_v58 = vpop.f32.mrf.mxu2  ;;  %v1507_v59 = vpop.f32.mrf.mxu1 }
 0x254   :  { %v1417_v60 = vadd.f32 %v1416_v38, %v1072_v56 }
 0x255   :  { %v1421_v61 = vpop.f32.mrf.mxu0 }
 0x256   :  { %v1506_v62 = vadd.f32 %v1505_v50, %v1417_v60 }
 0x258   :  { %v1568_v63 = vadd.f32 %v2496_v57, %v1506_v62 }
 0x259   :  { %v1073_v0 = vpop.f32.mrf.mxu3 }
 0x25a   :  { %1600 = vst [vmem:[#allocation11 + $0x70] sm:$0xff] %v1568_v63  ;;  %v1074_v1 = vadd.f32 %v1073_v0, %v984_v58 }
 0x25b   :  { %v987_v2 = vpop.f32.mrf.mxu2  ;;  %v1510_v3 = vpop.f32.mrf.mxu1 }
 0x25c   :  { %v1419_v4 = vadd.f32 %v1418_v52, %v1074_v1 }
 0x25d   :  { %v1423_v5 = vpop.f32.mrf.mxu0 }
 0x25e   :  { %v1508_v6 = vadd.f32 %v1507_v59, %v1419_v4 }
 0x260   :  { %v1569_v7 = vadd.f32 %v2496_v57, %v1508_v6 }
 0x261   :  { %v1076_v8 = vpop.f32.mrf.mxu3 }
 0x262   :  { %1601 = vst [vmem:[#allocation11 + $0x78] sm:$0xff] %v1569_v7  ;;  %v1077_v9 = vadd.f32 %v1076_v8, %v987_v2 }
 0x263   :  { %v989_v10 = vpop.f32.mrf.mxu2  ;;  %v1512_v11 = vpop.f32.mrf.mxu1 }
 0x264   :  { %v1422_v12 = vadd.f32 %v1421_v61, %v1077_v9 }
 0x265   :  { %v1426_v13 = vpop.f32.mrf.mxu0 }
 0x266   :  { %v1511_v14 = vadd.f32 %v1510_v3, %v1422_v12 }
 0x268   :  { %v1570_v15 = vadd.f32 %v2496_v57, %v1511_v14 }
 0x269   :  { %v1078_v16 = vpop.f32.mrf.mxu3 }
 0x26a   :  { %1602 = vst [vmem:[#allocation11 + $0x80] sm:$0xff] %v1570_v15  ;;  %v1079_v17 = vadd.f32 %v1078_v16, %v989_v10 }
 0x26b   :  { %v992_v18 = vpop.f32.mrf.mxu2  ;;  %v1515_v19 = vpop.f32.mrf.mxu1 }
 0x26c   :  { %v1424_v20 = vadd.f32 %v1423_v5, %v1079_v17 }
 0x26d   :  { %v1428_v21 = vpop.f32.mrf.mxu0 }
 0x26e   :  { %v1513_v22 = vadd.f32 %v1512_v11, %v1424_v20 }
 0x270   :  { %v1571_v23 = vadd.f32 %v2496_v57, %v1513_v22 }
 0x271   :  { %v1081_v24 = vpop.f32.mrf.mxu3 }
 0x272   :  { %1603 = vst [vmem:[#allocation11 + $0x88] sm:$0xff] %v1571_v23  ;;  %v1082_v25 = vadd.f32 %v1081_v24, %v992_v18 }
 0x273   :  { %v994_v26 = vpop.f32.mrf.mxu2  ;;  %v1517_v27 = vpop.f32.mrf.mxu1 }
 0x274   :  { %v1427_v28 = vadd.f32 %v1426_v13, %v1082_v25 }
 0x275   :  { %v1431_v29 = vpop.f32.mrf.mxu0 }
 0x276   :  { %v1516_v30 = vadd.f32 %v1515_v19, %v1427_v28 }
 0x278   :  { %v1572_v31 = vadd.f32 %v2496_v57, %v1516_v30 }
 0x279   :  { %v1083_v32 = vpop.f32.mrf.mxu3 }
 0x27a   :  { %1604 = vst [vmem:[#allocation11 + $0x90] sm:$0xff] %v1572_v31  ;;  %v1084_v33 = vadd.f32 %v1083_v32, %v994_v26 }
 0x27b   :  { %v997_v34 = vpop.f32.mrf.mxu2  ;;  %v1520_v35 = vpop.f32.mrf.mxu1 }
 0x27c   :  { %v1429_v36 = vadd.f32 %v1428_v21, %v1084_v33 }
 0x27d   :  { %v1433_v37 = vpop.f32.mrf.mxu0 }
 0x27e   :  { %v1518_v38 = vadd.f32 %v1517_v27, %v1429_v36 }
 0x280   :  { %v1573_v39 = vadd.f32 %v2496_v57, %v1518_v38 }
 0x281   :  { %v1086_v40 = vpop.f32.mrf.mxu3 }
 0x282   :  { %1605 = vst [vmem:[#allocation11 + $0x98] sm:$0xff] %v1573_v39  ;;  %v1087_v41 = vadd.f32 %v1086_v40, %v997_v34 }
 0x283   :  { %v999_v42 = vpop.f32.mrf.mxu2  ;;  %v1522_v43 = vpop.f32.mrf.mxu1 }
 0x284   :  { %v1432_v44 = vadd.f32 %v1431_v29, %v1087_v41 }
 0x285   :  { %v1436_v45 = vpop.f32.mrf.mxu0 }
 0x286   :  { %v1521_v46 = vadd.f32 %v1520_v35, %v1432_v44 }
 0x288   :  { %v1574_v47 = vadd.f32 %v2496_v57, %v1521_v46 }
 0x289   :  { %v1088_v48 = vpop.f32.mrf.mxu3 }
 0x28a   :  { %1606 = vst [vmem:[#allocation11 + $0xa0] sm:$0xff] %v1574_v47  ;;  %v1089_v49 = vadd.f32 %v1088_v48, %v999_v42 }
 0x28b   :  { %v1002_v50 = vpop.f32.mrf.mxu2  ;;  %v1525_v51 = vpop.f32.mrf.mxu1 }
 0x28c   :  { %v1434_v52 = vadd.f32 %v1433_v37, %v1089_v49 }
 0x28d   :  { %v1438_v53 = vpop.f32.mrf.mxu0 }
 0x28e   :  { %v1523_v54 = vadd.f32 %v1522_v43, %v1434_v52 }
 0x290   :  { %v1575_v55 = vadd.f32 %v2496_v57, %v1523_v54 }
 0x291   :  { %v1091_v56 = vpop.f32.mrf.mxu3 }
 0x292   :  { %1607 = vst [vmem:[#allocation11 + $0xa8] sm:$0xff] %v1575_v55  ;;  %v1092_v58 = vadd.f32 %v1091_v56, %v1002_v50 }
 0x293   :  { %v1004_v59 = vpop.f32.mrf.mxu2  ;;  %v1527_v60 = vpop.f32.mrf.mxu1 }
 0x294   :  { %v1437_v61 = vadd.f32 %v1436_v45, %v1092_v58 }
 0x295   :  { %v1441_v62 = vpop.f32.mrf.mxu0 }
 0x296   :  { %v1526_v63 = vadd.f32 %v1525_v51, %v1437_v61 }
 0x298   :  { %v1576_v0 = vadd.f32 %v2496_v57, %v1526_v63 }
 0x299   :  { %v1093_v1 = vpop.f32.mrf.mxu3 }
 0x29a   :  { %1608 = vst [vmem:[#allocation11 + $0xb0] sm:$0xff] %v1576_v0  ;;  %v1094_v2 = vadd.f32 %v1093_v1, %v1004_v59 }
 0x29b   :  { %v1007_v3 = vpop.f32.mrf.mxu2  ;;  %v1530_v4 = vpop.f32.mrf.mxu1 }
 0x29c   :  { %v1439_v5 = vadd.f32 %v1438_v53, %v1094_v2 }
 0x29d   :  { %v1443_v7 = vpop.f32.mrf.mxu0 }
 0x29e   :  { %v1528_v6 = vadd.f32 %v1527_v60, %v1439_v5 }
 0x2a0   :  { %v1577_v8 = vadd.f32 %v2496_v57, %v1528_v6 }
 0x2a1   :  { %v1096_v9 = vpop.f32.mrf.mxu3 }
 0x2a2   :  { %1609 = vst [vmem:[#allocation11 + $0xb8] sm:$0xff] %v1577_v8  ;;  %v1097_v10 = vadd.f32 %v1096_v9, %v1007_v3 }
 0x2a3   :  { %v1009_v11 = vpop.f32.mrf.mxu2  ;;  %v1532_v12 = vpop.f32.mrf.mxu1 }
 0x2a4   :  { %v1442_v13 = vadd.f32 %v1441_v62, %v1097_v10 }
 0x2a5   :  { %v1446_v17 = vpop.f32.mrf.mxu0 }
 0x2a6   :  { %v1531_v14 = vadd.f32 %v1530_v4, %v1442_v13 }
 0x2a8   :  { %v1578_v15 = vadd.f32 %v2496_v57, %v1531_v14 }
 0x2a9   :  { %v1098_v16 = vpop.f32.mrf.mxu3 }
 0x2aa   :  { %1610 = vst [vmem:[#allocation11 + $0xc0] sm:$0xff] %v1578_v15  ;;  %v1099_v18 = vadd.f32 %v1098_v16, %v1009_v11 }
 0x2ab   :  { %v1012_v19 = vpop.f32.mrf.mxu2  ;;  %v1535_v20 = vpop.f32.mrf.mxu1 }
 0x2ac   :  { %v1444_v21 = vadd.f32 %v1443_v7, %v1099_v18 }
 0x2ad   :  { %v1448_v27 = vpop.f32.mrf.mxu0 }
 0x2ae   :  { %v1533_v22 = vadd.f32 %v1532_v12, %v1444_v21 }
 0x2b0   :  { %v1579_v23 = vadd.f32 %v2496_v57, %v1533_v22 }
 0x2b1   :  { %v1101_v24 = vpop.f32.mrf.mxu3 }
 0x2b2   :  { %1611 = vst [vmem:[#allocation11 + $0xc8] sm:$0xff] %v1579_v23  ;;  %v1102_v25 = vadd.f32 %v1101_v24, %v1012_v19 }
 0x2b3   :  { %v1014_v26 = vpop.f32.mrf.mxu2  ;;  %v1537_v29 = vpop.f32.mrf.mxu1 }
 0x2b4   :  { %v1447_v28 = vadd.f32 %v1446_v17, %v1102_v25 }
 0x2b5   :  { %v1451_v36 = vpop.f32.mrf.mxu0 }
 0x2b6   :  { %v1536_v30 = vadd.f32 %v1535_v20, %v1447_v28 }
 0x2b8   :  { %v1580_v31 = vadd.f32 %v2496_v57, %v1536_v30 }
 0x2b9   :  { %v1103_v32 = vpop.f32.mrf.mxu3 }
 0x2ba   :  { %1612 = vst [vmem:[#allocation11 + $0xd0] sm:$0xff] %v1580_v31  ;;  %v1104_v33 = vadd.f32 %v1103_v32, %v1014_v26 }
 0x2bb   :  { %v1017_v34 = vpop.f32.mrf.mxu2  ;;  %v1540_v38 = vpop.f32.mrf.mxu1 }
 0x2bc   :  { %v1449_v35 = vadd.f32 %v1448_v27, %v1104_v33 }
 0x2bd   :  { %v1453_v45 = vpop.f32.mrf.mxu0 }
 0x2be   :  { %v1538_v37 = vadd.f32 %v1537_v29, %v1449_v35 }
 0x2c0   :  { %v1581_v39 = vadd.f32 %v2496_v57, %v1538_v37 }
 0x2c1   :  { %v1106_v40 = vpop.f32.mrf.mxu3 }
 0x2c2   :  { %1613 = vst [vmem:[#allocation11 + $0xd8] sm:$0xff] %v1581_v39  ;;  %v1107_v41 = vadd.f32 %v1106_v40, %v1017_v34 }
 0x2c3   :  { %v1019_v43 = vpop.f32.mrf.mxu2  ;;  %v1542_v48 = vpop.f32.mrf.mxu1 }
 0x2c4   :  { %v1452_v42 = vadd.f32 %v1451_v36, %v1107_v41 }
 0x2c5   :  { %v1456_v55 = vpop.f32.mrf.mxu0 }
 0x2c6   :  { %v1541_v44 = vadd.f32 %v1540_v38, %v1452_v42 }
 0x2c8   :  { %v1582_v46 = vadd.f32 %v2496_v57, %v1541_v44 }
 0x2c9   :  { %v1108_v47 = vpop.f32.mrf.mxu3 }
 0x2ca   :  { %1614 = vst [vmem:[#allocation11 + $0xe0] sm:$0xff] %v1582_v46  ;;  %v1109_v49 = vadd.f32 %v1108_v47, %v1019_v43 }
 0x2cb   :  { %v1022_v52 = vpop.f32.mrf.mxu2  ;;  %v1545_v58 = vpop.f32.mrf.mxu1 }
 0x2cc   :  { %v1454_v50 = vadd.f32 %v1453_v45, %v1109_v49 }
 0x2cd   :  { %v1458_v1 = vpop.f32.mrf.mxu0 }
 0x2ce   :  { %v1543_v51 = vadd.f32 %v1542_v48, %v1454_v50 }
 0x2d0   :  { %v1583_v53 = vadd.f32 %v2496_v57, %v1543_v51 }
 0x2d1   :  { %v1111_v54 = vpop.f32.mrf.mxu3 }
 0x2d2   :  { %1615 = vst [vmem:[#allocation11 + $0xe8] sm:$0xff] %v1583_v53  ;;  %v1112_v56 = vadd.f32 %v1111_v54, %v1022_v52 }
 0x2d3   :  { %v1024_v62 = vpop.f32.mrf.mxu2  ;;  %v1547_v3 = vpop.f32.mrf.mxu1 }
 0x2d4   :  { %v1457_v59 = vadd.f32 %v1456_v55, %v1112_v56 }
 0x2d6   :  { %v1546_v60 = vadd.f32 %v1545_v58, %v1457_v59 }
 0x2d8   :  { %v1584_v61 = vadd.f32 %v2496_v57, %v1546_v60 }
 0x2d9   :  { %v1113_v63 = vpop.f32.mrf.mxu3 }
 0x2da   :  { %1616 = vst [vmem:[#allocation11 + $0xf0] sm:$0xff] %v1584_v61  ;;  %v1114_v0 = vadd.f32 %v1113_v63, %v1024_v62 }
 0x2dc   :  { %v1459_v2 = vadd.f32 %v1458_v1, %v1114_v0 }
 0x2de   :  { %v1548_v4 = vadd.f32 %v1547_v3, %v1459_v2 }
 0x2e0   :  { %v1585_v5 = vadd.f32 %v2496_v57, %v1548_v4 }
 0x2e2   :  { %1617 = vst [vmem:[#allocation11 + $0xf8] sm:$0xff] %v1585_v5 }
 0x2e3   :  { %1630 = dma.vmem_to_hbm [thread:$0]  %s1623_s15, 4096, %s1625_s18, [#allocation5], %s2434_s26, %s2434_s26, %s2435_s27  }
 0x2e4   :  { %2431 = dma.done.wait [#allocation5], 4096  }
 0x2e5   :  { %2432 = vsyncadd [#allocation5], 4294963200 }
 0x2e6   :  { %1635 = vsyncpa [#allocation4], 1 }
 0x2e7   :  { %1636 = vsyncpa [#allocation7], 1 }
 0x2e8   :  { %1637 = vsyncpa [#allocation10], 1 }
 0x2e9   :  { %1638 = vsyncpa [#allocation5], 1 }

</bundles_post_ra>
